<compile_context>
chip_gen: v7x
topology: tpu7x:2x2x1
jax: 0.10.0
libtpu: 0.0.40
codegen_flags: <defaults>
</compile_context>

<pallas_src>
import jax
import jax.numpy as jnp
from jax.experimental import pallas as pl
from jax.experimental.pallas import tpu as pltpu

HIDDEN = 768          # BERT hidden size
EMB_DIM = 32          # emb_dim of RadBertEmbedder
LN_EPS = 1e-5         # torch.nn.LayerNorm default eps


def _round_up(x, m):
    return (x + m - 1) // m * m


def _layernorm(x, gamma, beta):
    # Biased variance (divide by N), matching torch.nn.LayerNorm.
    mu = jnp.mean(x, axis=-1, keepdims=True)
    xc = x - mu
    var = jnp.mean(xc * xc, axis=-1, keepdims=True)
    return xc * jax.lax.rsqrt(var + LN_EPS) * gamma + beta


def radbert_head_kernel(c_ref, w1_ref, w2_ref, p_ref, o_ref):
    # Packed small params: rows 0..5 = b1, g1, be1, b2, g2, be2 (6,7 = pad).
    p = p_ref[...]
    b1, g1, be1 = p[0:1, :], p[1:2, :], p[2:3, :]
    b2, g2, be2 = p[3:4, :], p[4:5, :], p[5:6, :]

    # Linear(768 -> emb_dim): operands in the input dtype, f32 accumulation,
    # full precision (compute is far under the HBM roofline, so it's free).
    h = jnp.dot(c_ref[...], w1_ref[...],
                preferred_element_type=jnp.float32,
                precision=jax.lax.Precision.HIGHEST) + b1
    # LayerNorm(emb_dim), in f32.
    h = _layernorm(h, g1, be1)
    # ReLU
    h = jnp.maximum(h, 0.0)
    # Linear(emb_dim -> emb_dim), tiny 32x32 matmul, f32.
    h = jnp.dot(h, w2_ref[...],
                preferred_element_type=jnp.float32,
                precision=jax.lax.Precision.HIGHEST) + b2
    # LayerNorm(emb_dim)
    h = _layernorm(h, g2, be2)

    o_ref[...] = h.astype(o_ref.dtype)


def pack_params(params):
    """(w1,b1,g1,be1,w2,b2,g2,be2) -> (w1, w2, packed[8, EMB_DIM])."""
    w1, b1, g1, be1, w2, b2, g2, be2 = params
    packed = jnp.concatenate(
        [b1, g1, be1, b2, g2, be2, jnp.zeros((2, EMB_DIM), jnp.float32)],
        axis=0)                                       # [8, EMB_DIM]
    return w1, w2, packed


def radbert_embedder_head(c, params, *, tb=2048, out_dtype=jnp.float32):
    """c: [B, 768] ([CLS] hidden state). Returns [B, emb_dim] in out_dtype."""
    B, H = c.shape
    assert H == HIDDEN, (B, H)
    w1, w2, packed = pack_params(params)

    # Stream c in its native dtype (a wrapper-side cast would add a full
    # extra HBM pass on this bandwidth-bound kernel). Match the tiny,
    # VMEM-resident w1 to c's dtype so the first dot has uniform operands.
    w1 = w1.astype(c.dtype)

    # ---- tile / grid selection --------------------------------------------
    # Even split across tiles (minimal padding), capped at `tb` rows per tile;
    # force >= 2 tiles for moderately large batches so the "parallel" grid
    # axis can actually use both v7x TensorCores (harmless on v5e/v6e).
    n_tiles = max(pl.cdiv(B, tb), 2 if B >= 256 else 1)
    if n_tiles == 1:
        TB = B                    # block == full array: no 8-row constraint
        Bp = B
    else:
        TB = _round_up(pl.cdiv(B, n_tiles), 8)
        n_tiles = pl.cdiv(B, TB)
        Bp = n_tiles * TB         # pads < 8 * n_tiles rows in the worst case

    c_in = c if Bp == B else jnp.pad(c, ((0, Bp - B), (0, 0)))

    # Scoped-VMEM budget: double-buffered input + output tiles, resident
    # weights, plus slack. Floors at 16 MiB, capped under v7x's 64 MiB.
    in_bytes = TB * HIDDEN * jnp.dtype(c.dtype).itemsize
    out_bytes = TB * EMB_DIM * jnp.dtype(out_dtype).itemsize
    vmem_limit = int(min(max(2 * (in_bytes + out_bytes) + (4 << 20),
                             16 << 20), 64 << 20))

    out = pl.pallas_call(
        radbert_head_kernel,
        out_shape=jax.ShapeDtypeStruct((Bp, EMB_DIM), out_dtype),
        grid=(Bp // TB,),
        in_specs=[
            pl.BlockSpec((TB, HIDDEN), lambda i: (i, 0)),        # streamed c
            pl.BlockSpec((HIDDEN, EMB_DIM), lambda i: (0, 0)),   # resident w1
            pl.BlockSpec((EMB_DIM, EMB_DIM), lambda i: (0, 0)),  # resident w2
            pl.BlockSpec((8, EMB_DIM), lambda i: (0, 0)),        # packed vecs
        ],
        out_specs=pl.BlockSpec((TB, EMB_DIM), lambda i: (i, 0)),
        compiler_params=pltpu.CompilerParams(
            dimension_semantics=("parallel",),
            vmem_limit_bytes=vmem_limit),
    )(c_in, w1, w2, packed)
    return out[:B]


def init_params(key, emb_dim=EMB_DIM, hidden=HIDDEN):
    """Deterministic synthetic init mirroring the module's parameter shapes."""
    k1, k2, k3, k4 = jax.random.split(key, 4)
    # nn.Linear(768, emb_dim): weight [emb_dim, 768], bias [emb_dim]
    #   -> stored transposed as [768, emb_dim] for y = x @ W + b
    bound1 = 1.0 / jnp.sqrt(hidden)
    w1 = jax.random.uniform(k1, (hidden, emb_dim), jnp.float32, -bound1, bound1)
    b1 = jax.random.uniform(k2, (1, emb_dim), jnp.float32, -bound1, bound1)
    # nn.LayerNorm(emb_dim): gamma=1, beta=0
    g1 = jnp.ones((1, emb_dim), jnp.float32)
    be1 = jnp.zeros((1, emb_dim), jnp.float32)
    # nn.Linear(emb_dim, emb_dim)
    bound2 = 1.0 / jnp.sqrt(emb_dim)
    w2 = jax.random.uniform(k3, (emb_dim, emb_dim), jnp.float32, -bound2, bound2)
    b2 = jax.random.uniform(k4, (1, emb_dim), jnp.float32, -bound2, bound2)
    g2 = jnp.ones((1, emb_dim), jnp.float32)
    be2 = jnp.zeros((1, emb_dim), jnp.float32)
    return (w1, b1, g1, be1, w2, b2, g2, be2)


def reference_head(c, params):
    w1, b1, g1, be1, w2, b2, g2, be2 = params

    def ln(x, g, b):
        mu = jnp.mean(x, axis=-1, keepdims=True)
        var = jnp.mean((x - mu) ** 2, axis=-1, keepdims=True)
        return (x - mu) / jnp.sqrt(var + LN_EPS) * g + b

    hp = jax.lax.Precision.HIGHEST
    h = jnp.dot(c, w1, precision=hp) + b1
    h = ln(h, g1, be1)
    h = jnp.maximum(h, 0.0)
    h = jnp.dot(h, w2, precision=hp) + b2
    return ln(h, g2, be2)


if __name__ == "__main__":
    key = jax.random.PRNGKey(0)
    k_in, k_par = jax.random.split(key)
    params = init_params(k_par)

    # Small case: single full-array tile, no padding (B=2).
    B = 2
    # Synthetic stand-in for outputs.last_hidden_state[:, 0]  ([CLS] token).
    c = jax.random.normal(k_in, (B, HIDDEN), dtype=jnp.float32)
    out = jax.block_until_ready(radbert_embedder_head(c, params))
    ref = reference_head(c, params)
    assert out.shape == (B, EMB_DIM), out.shape
    assert jnp.allclose(out, ref, atol=1e-3, rtol=1e-3), (
        float(jnp.max(jnp.abs(out - ref))))

    # Multi-tile path (grid > 1, minimal pad): B=20 with 8-row tiles.
    B2 = 20
    c2 = jax.random.normal(jax.random.PRNGKey(1), (B2, HIDDEN), jnp.float32)
    out2 = jax.block_until_ready(radbert_embedder_head(c2, params, tb=8))
    ref2 = reference_head(c2, params)
    assert out2.shape == (B2, EMB_DIM), out2.shape
    assert jnp.allclose(out2, ref2, atol=1e-3, rtol=1e-3), (
        float(jnp.max(jnp.abs(out2 - ref2))))

    print("KERNEL_OK")
</pallas_src>

<mosaic_0001>
module attributes {stable_mosaic.version = 11 : i64} {
  func.func @radbert_head_kernel(%arg0: i32, %arg1: memref<2x768xf32, #tpu.memory_space<vmem>>, %arg2: memref<768x32xf32, #tpu.memory_space<vmem>>, %arg3: memref<32x32xf32, #tpu.memory_space<vmem>>, %arg4: memref<8x32xf32, #tpu.memory_space<vmem>>, %arg5: memref<2x32xf32, #tpu.memory_space<vmem>>) attributes {dimension_semantics = [#tpu.dimension_semantics<parallel>], iteration_bounds = array<i64: 1>, scalar_prefetch = 0 : i64, scratch_operands = 0 : i64, tpu.core_type = #tpu.core_type<tc>, window_params = [{transform_indices = @transform_0, window_bounds = array<i64: 2, 768>}, {pipeline_mode = #tpu.pipeline_mode<synchronous>, transform_indices = @transform_1, window_bounds = array<i64: 768, 32>}, {pipeline_mode = #tpu.pipeline_mode<synchronous>, transform_indices = @transform_2, window_bounds = array<i64: 32, 32>}, {pipeline_mode = #tpu.pipeline_mode<synchronous>, transform_indices = @transform_3, window_bounds = array<i64: 8, 32>}, {transform_indices = @transform_4, window_bounds = array<i64: 2, 32>}]} {
    %c0 = arith.constant 0 : index
    %c0_0 = arith.constant 0 : index
    %0 = vector.load %arg4[%c0, %c0_0] : memref<8x32xf32, #tpu.memory_space<vmem>>, vector<8x32xf32>
    %1 = vector.extract_strided_slice %0 {offsets = [0, 0], sizes = [1, 32], strides = [1, 1]} : vector<8x32xf32> to vector<1x32xf32>
    %2 = vector.extract_strided_slice %0 {offsets = [1, 0], sizes = [1, 32], strides = [1, 1]} : vector<8x32xf32> to vector<1x32xf32>
    %3 = vector.extract_strided_slice %0 {offsets = [2, 0], sizes = [1, 32], strides = [1, 1]} : vector<8x32xf32> to vector<1x32xf32>
    %4 = vector.extract_strided_slice %0 {offsets = [3, 0], sizes = [1, 32], strides = [1, 1]} : vector<8x32xf32> to vector<1x32xf32>
    %5 = vector.extract_strided_slice %0 {offsets = [4, 0], sizes = [1, 32], strides = [1, 1]} : vector<8x32xf32> to vector<1x32xf32>
    %6 = vector.extract_strided_slice %0 {offsets = [5, 0], sizes = [1, 32], strides = [1, 1]} : vector<8x32xf32> to vector<1x32xf32>
    %c0_1 = arith.constant 0 : index
    %c0_2 = arith.constant 0 : index
    %7 = vector.load %arg1[%c0_1, %c0_2] : memref<2x768xf32, #tpu.memory_space<vmem>>, vector<2x768xf32>
    %c0_3 = arith.constant 0 : index
    %c0_4 = arith.constant 0 : index
    %8 = vector.load %arg2[%c0_3, %c0_4] : memref<768x32xf32, #tpu.memory_space<vmem>>, vector<768x32xf32>
    %cst = arith.constant dense<0.000000e+00> : vector<2x32xf32>
    %9 = tpu.matmul %7, %8, %cst {dimension_numbers = #tpu.dot_dimension_numbers<[1], [0], [0], [1], [0, 0, 1, 1], [], []>, precision = #tpu.contract_precision<fp32>} : vector<2x768xf32>, vector<768x32xf32>, vector<2x32xf32> -> vector<2x32xf32>
    %10 = vector.broadcast %1 : vector<1x32xf32> to vector<2x32xf32>
    %11 = arith.addf %9, %10 : vector<2x32xf32>
    %cst_5 = arith.constant dense<0.000000e+00> : vector<2xf32>
    %12 = vector.multi_reduction <add>, %11, %cst_5 [1] : vector<2x32xf32> to vector<2xf32>
    %13 = vector.shape_cast %12 : vector<2xf32> to vector<2x1xf32>
    %cst_6 = arith.constant 3.200000e+01 : f32
    %14 = vector.broadcast %cst_6 : f32 to vector<2x1xf32>
    %15 = arith.divf %13, %14 : vector<2x1xf32>
    %16 = vector.broadcast %15 : vector<2x1xf32> to vector<2x32xf32>
    %17 = arith.subf %11, %16 : vector<2x32xf32>
    %18 = arith.mulf %17, %17 : vector<2x32xf32>
    %cst_7 = arith.constant dense<0.000000e+00> : vector<2xf32>
    %19 = vector.multi_reduction <add>, %18, %cst_7 [1] : vector<2x32xf32> to vector<2xf32>
    %20 = vector.shape_cast %19 : vector<2xf32> to vector<2x1xf32>
    %cst_8 = arith.constant 3.200000e+01 : f32
    %21 = vector.broadcast %cst_8 : f32 to vector<2x1xf32>
    %22 = arith.divf %20, %21 : vector<2x1xf32>
    %cst_9 = arith.constant 9.99999974E-6 : f32
    %23 = vector.broadcast %cst_9 : f32 to vector<2x1xf32>
    %24 = arith.addf %22, %23 : vector<2x1xf32>
    %25 = math.rsqrt %24 : vector<2x1xf32>
    %26 = vector.broadcast %25 : vector<2x1xf32> to vector<2x32xf32>
    %27 = arith.mulf %17, %26 : vector<2x32xf32>
    %28 = vector.broadcast %2 : vector<1x32xf32> to vector<2x32xf32>
    %29 = arith.mulf %27, %28 : vector<2x32xf32>
    %30 = vector.broadcast %3 : vector<1x32xf32> to vector<2x32xf32>
    %31 = arith.addf %29, %30 : vector<2x32xf32>
    %cst_10 = arith.constant 0.000000e+00 : f32
    %32 = vector.broadcast %cst_10 : f32 to vector<2x32xf32>
    %33 = arith.maximumf %31, %32 : vector<2x32xf32>
    %c0_11 = arith.constant 0 : index
    %c0_12 = arith.constant 0 : index
    %34 = vector.load %arg3[%c0_11, %c0_12] : memref<32x32xf32, #tpu.memory_space<vmem>>, vector<32x32xf32>
    %cst_13 = arith.constant dense<0.000000e+00> : vector<2x32xf32>
    %35 = tpu.matmul %33, %34, %cst_13 {dimension_numbers = #tpu.dot_dimension_numbers<[1], [0], [0], [1], [0, 0, 1, 1], [], []>, precision = #tpu.contract_precision<fp32>} : vector<2x32xf32>, vector<32x32xf32>, vector<2x32xf32> -> vector<2x32xf32>
    %36 = vector.broadcast %4 : vector<1x32xf32> to vector<2x32xf32>
    %37 = arith.addf %35, %36 : vector<2x32xf32>
    %cst_14 = arith.constant dense<0.000000e+00> : vector<2xf32>
    %38 = vector.multi_reduction <add>, %37, %cst_14 [1] : vector<2x32xf32> to vector<2xf32>
    %39 = vector.shape_cast %38 : vector<2xf32> to vector<2x1xf32>
    %cst_15 = arith.constant 3.200000e+01 : f32
    %40 = vector.broadcast %cst_15 : f32 to vector<2x1xf32>
    %41 = arith.divf %39, %40 : vector<2x1xf32>
    %42 = vector.broadcast %41 : vector<2x1xf32> to vector<2x32xf32>
    %43 = arith.subf %37, %42 : vector<2x32xf32>
    %44 = arith.mulf %43, %43 : vector<2x32xf32>
    %cst_16 = arith.constant dense<0.000000e+00> : vector<2xf32>
    %45 = vector.multi_reduction <add>, %44, %cst_16 [1] : vector<2x32xf32> to vector<2xf32>
    %46 = vector.shape_cast %45 : vector<2xf32> to vector<2x1xf32>
    %cst_17 = arith.constant 3.200000e+01 : f32
    %47 = vector.broadcast %cst_17 : f32 to vector<2x1xf32>
    %48 = arith.divf %46, %47 : vector<2x1xf32>
    %cst_18 = arith.constant 9.99999974E-6 : f32
    %49 = vector.broadcast %cst_18 : f32 to vector<2x1xf32>
    %50 = arith.addf %48, %49 : vector<2x1xf32>
    %51 = math.rsqrt %50 : vector<2x1xf32>
    %52 = vector.broadcast %51 : vector<2x1xf32> to vector<2x32xf32>
    %53 = arith.mulf %43, %52 : vector<2x32xf32>
    %54 = vector.broadcast %5 : vector<1x32xf32> to vector<2x32xf32>
    %55 = arith.mulf %53, %54 : vector<2x32xf32>
    %56 = vector.broadcast %6 : vector<1x32xf32> to vector<2x32xf32>
    %57 = arith.addf %55, %56 : vector<2x32xf32>
    %c0_19 = arith.constant 0 : index
    %c0_20 = arith.constant 0 : index
    %58 = vector.load %arg5[%c0_19, %c0_20] : memref<2x32xf32, #tpu.memory_space<vmem>>, vector<2x32xf32>
    tpu.vector_store %arg5[%c0_19, %c0_20], %57 {strides = array<i32>} : memref<2x32xf32, #tpu.memory_space<vmem>>, vector<2x32xf32>,
    return
  }
  func.func @transform_0(%arg0: i32) -> (i32, i32) {
    %c0_i32 = arith.constant 0 : i32
    %c0_i32_0 = arith.constant 0 : i32
    return %arg0, %c0_i32 : i32, i32
  }
  func.func @transform_1(%arg0: i32) -> (i32, i32) {
    %c0_i32 = arith.constant 0 : i32
    %c0_i32_0 = arith.constant 0 : i32
    %c0_i32_1 = arith.constant 0 : i32
    return %c0_i32, %c0_i32_0 : i32, i32
  }
  func.func @transform_2(%arg0: i32) -> (i32, i32) {
    %c0_i32 = arith.constant 0 : i32
    %c0_i32_0 = arith.constant 0 : i32
    %c0_i32_1 = arith.constant 0 : i32
    return %c0_i32, %c0_i32_0 : i32, i32
  }
  func.func @transform_3(%arg0: i32) -> (i32, i32) {
    %c0_i32 = arith.constant 0 : i32
    %c0_i32_0 = arith.constant 0 : i32
    %c0_i32_1 = arith.constant 0 : i32
    return %c0_i32, %c0_i32_0 : i32, i32
  }
  func.func @transform_4(%arg0: i32) -> (i32, i32) {
    %c0_i32 = arith.constant 0 : i32
    %c0_i32_0 = arith.constant 0 : i32
    return %arg0, %c0_i32 : i32, i32
  }
}

</mosaic_0001>

<bundles_post_ra>
// kernel: tpu_custom_call.1
= control target key start
LH: loop header
LB: loop body
LE: loop exit
PB: predicated region body
PF: predicated region fallthrough
CT: control target
= control target key end

     0   :  { %v117_v19 = vlaneseq  ;;  %v4685_v24 = vmov 1983009808   ;;  %s6823_s0 = inlined_call_operand.vmem [shape: f32[2,768], index: 0, kind: input, shape index: {}]   ;;  %s6824_s1 = inlined_call_operand.vmem [shape: f32[768,32], index: 1, kind: input, shape index: {}]   ;;  %s6825_s2 = inlined_call_operand.vmem [shape: f32[32,32], index: 2, kind: input, shape index: {}]   ;;  %s6826_s3 = inlined_call_operand.vmem [shape: f32[8,32], index: 3, kind: input, shape index: {}]   ;;  %s6827_s4 = inlined_call_operand.hbm [shape: f32[2,32], index: 4, kind: output, shape index: {}]  }
   0x1   :  { %v37_v0 = vld [vmem:[%s6824_s1 + $0x80] sm:$0xff]  ;;  %v38_v1 = vld [vmem:[%s6824_s1 + $0x88] sm:$0xff]  ;;  %v39_v7 = vld [vmem:[%s6824_s1 + $0x90] sm:$0xff]  ;;  %v4762_v25 = vunpack.c.l.s4 %v4685_v24 }
   0x2   :  { %v21_v2 = vld [vmem:[%s6824_s1] sm:$0xff]  ;;  %v203_v3 = vand.u32 4294901760, %v37_v0  ;;  %v206_v4 = vand.u32 4294901760, %v38_v1  ;;  %v22_v5 = vld [vmem:[%s6824_s1 + $0x8] sm:$0xff]  ;;  %v40_v8 = vld [vmem:[%s6824_s1 + $0x98] sm:$0xff]  ;;  %v209_v10 = vand.u32 4294901760, %v39_v7 }
   0x3   :  { %v155_v6 = vand.u32 4294901760, %v21_v2  ;;  %v158_v9 = vand.u32 4294901760, %v22_v5  ;;  %v212_v11 = vand.u32 4294901760, %v40_v8  ;;  %v23_v12 = vld [vmem:[%s6824_s1 + $0x10] sm:$0xff]  ;;  %v24_v13 = vld [vmem:[%s6824_s1 + $0x18] sm:$0xff]  ;;  %v41_v14 = vld [vmem:[%s6824_s1 + $0xa0] sm:$0xff] }
   0x4   :  { %v4742_v15 = vpack.c.bf16 %v206_v4, %v203_v3  ;;  %v42_v16 = vld [vmem:[%s6824_s1 + $0xa8] sm:$0xff]  ;;  %v25_v17 = vld [vmem:[%s6824_s1 + $0x20] sm:$0xff]  ;;  %v4753_v20 = vsub.f32 %v37_v0, %v203_v3  ;;  %v43_v23 = vld [vmem:[%s6824_s1 + $0xb0] sm:$0xff]  ;;  %v4765_v26 = vsub.f32 %v38_v1, %v206_v4  ;;  %v161_v27 = vand.u32 4294901760, %v23_v12 }
   0x5   :  { %v26_v18 = vld [vmem:[%s6824_s1 + $0x28] sm:$0xff]  ;;  %v4755_v21 = vpack.c.bf16 %v158_v9, %v155_v6  ;;  %v4757_v22 = vpack.c.bf16 %v212_v11, %v209_v10  ;;  %v164_v28 = vand.u32 4294901760, %v24_v13  ;;  %v215_v29 = vand.u32 4294901760, %v41_v14  ;;  %v44_v34 = vld [vmem:[%s6824_s1 + $0xb8] sm:$0xff]  ;;  %v27_v35 = vld [vmem:[%s6824_s1 + $0x30] sm:$0xff] }
   0x6   :  { %4029 = vmatprep.subr.bf16.mxu1 %v4742_v15  ;;  %v4768_v30 = vsub.f32 %v21_v2, %v155_v6  ;;  %v218_v31 = vand.u32 4294901760, %v42_v16  ;;  %v167_v32 = vand.u32 4294901760, %v25_v17  ;;  %v170_v33 = vand.u32 4294901760, %v26_v18  ;;  %v28_v40 = vld [vmem:[%s6824_s1 + $0x38] sm:$0xff]  ;;  %v45_v41 = vld [vmem:[%s6824_s1 + $0xc0] sm:$0xff]  ;;  %v46_v42 = vld [vmem:[%s6824_s1 + $0xc8] sm:$0xff] }
   0x7   :  { %4031 = vmatpush3.bf16.msra.mxu1 %v4755_v21  ;;  %v4776_v36 = vsub.f32 %v22_v5, %v158_v9  ;;  %v4779_v37 = vsub.f32 %v39_v7, %v209_v10  ;;  %v4781_v38 = vpack.c.bf16 %v164_v28, %v161_v27  ;;  %v221_v39 = vand.u32 4294901760, %v43_v23  ;;  %v29_v51 = vld [vmem:[%s6824_s1 + $0x40] sm:$0xff]  ;;  %v30_v52 = vld [vmem:[%s6824_s1 + $0x48] sm:$0xff]  ;;  %v47_v57 = vld [vmem:[%s6824_s1 + $0xd0] sm:$0xff] }
   0x8   :  { %4033 = vmatprep.subr.bf16.mxu1 %v4757_v22  ;;  %v4792_v43 = vsub.f32 %v40_v8, %v212_v11  ;;  %v4794_v44 = vsub.f32 %v23_v12, %v161_v27  ;;  %v4796_v45 = vsub.f32 %v24_v13, %v164_v28  ;;  %v4798_v46 = vpack.c.bf16 %v218_v31, %v215_v29  ;;  %v48_v58 = vld [vmem:[%s6824_s1 + $0xd8] sm:$0xff]  ;;  %v31_v63 = vld [vmem:[%s6824_s1 + $0x50] sm:$0xff]  ;;  %v49_v1 = vld [vmem:[%s6824_s1 + $0xe0] sm:$0xff] }
   0x9   :  { %v4800_v47 = vsub.f32 %v41_v14, %v215_v29  ;;  %v4802_v48 = vsub.f32 %v42_v16, %v218_v31  ;;  %v224_v49 = vand.u32 4294901760, %v44_v34  ;;  %v173_v50 = vand.u32 4294901760, %v27_v35  ;;  %v32_v0 = vld [vmem:[%s6824_s1 + $0x58] sm:$0xff]  ;;  %v50_v6 = vld [vmem:[%s6824_s1 + $0xe8] sm:$0xff]  ;;  %v33_v7 = vld [vmem:[%s6824_s1 + $0x60] sm:$0xff] }
   0xa   :  { %v4811_v53 = vpack.c.bf16 %v170_v33, %v167_v32  ;;  %v176_v54 = vand.u32 4294901760, %v28_v40  ;;  %v227_v55 = vand.u32 4294901760, %v45_v41  ;;  %v230_v56 = vand.u32 4294901760, %v46_v42  ;;  %v34_v8 = vld [vmem:[%s6824_s1 + $0x68] sm:$0xff] }
   0xb   :  { %4035 = vmatpush3.bf16.msra.mxu1 %v4781_v38  ;;  %v4820_v59 = vsub.f32 %v25_v17, %v167_v32  ;;  %v4822_v60 = vsub.f32 %v26_v18, %v170_v33  ;;  %v4824_v61 = vpack.c.bf16 %v224_v49, %v221_v39  ;;  %v4826_v62 = vsub.f32 %v43_v23, %v221_v39  ;;  %v51_v33 = vld [vmem:[%s6824_s1 + $0xf0] sm:$0xff] }
   0xc   :  { %7012 = vst [vmem:[#allocation5_spill] sm:$0xff] %v4811_v53  ;;  %4037 = vmatprep.subr.bf16.mxu1 %v4798_v46  ;;  %v4837_v2 = vsub.f32 %v44_v34, %v224_v49  ;;  %v4839_v3 = vsub.f32 %v27_v35, %v173_v50  ;;  %v179_v4 = vand.u32 4294901760, %v29_v51  ;;  %v182_v5 = vand.u32 4294901760, %v30_v52  ;;  %v52_v34 = vld [vmem:[%s6824_s1 + $0xf8] sm:$0xff] }
   0xd   :  { %7013 = vst [vmem:[#allocation6_spill] sm:$0xff] %v4824_v61  ;;  %v4850_v9 = vpack.c.bf16 %v176_v54, %v173_v50  ;;  %v4852_v10 = vsub.f32 %v28_v40, %v176_v54  ;;  %v4854_v11 = vpack.c.bf16 %v230_v56, %v227_v55  ;;  %v4856_v12 = vsub.f32 %v45_v41, %v227_v55  ;;  %v4899_v54 = vld [vmem:[%s6824_s1 + $0x78] sm:$0xff] }
   0xe   :  { %v233_v13 = vand.u32 4294901760, %v47_v57  ;;  %v236_v14 = vand.u32 4294901760, %v48_v58  ;;  %v185_v16 = vand.u32 4294901760, %v31_v63  ;;  %v188_v17 = vand.u32 4294901760, %v32_v0 }
   0xf   :  { %7014 = vst [vmem:[#allocation7_spill] sm:$0xff] %v4850_v9  ;;  %7015 = vst [vmem:[#allocation8_spill] sm:$0xff] %v4854_v11  ;;  %4039 = vmatpush3.bf16.msra.mxu1 %v4811_v53  ;;  %v239_v18 = vand.u32 4294901760, %v49_v1  ;;  %v242_v23 = vand.u32 4294901760, %v50_v6  ;;  %v191_v24 = vand.u32 4294901760, %v33_v7  ;;  %v194_v27 = vand.u32 4294901760, %v34_v8 }
  0x10   :  { %4041 = vmatprep.subr.bf16.mxu1 %v4824_v61  ;;  %v4860_v28 = vsub.f32 %v46_v42, %v230_v56  ;;  %v4862_v29 = vpack.c.bf16 %v182_v5, %v179_v4  ;;  %v4864_v31 = vsub.f32 %v29_v51, %v179_v4  ;;  %v4866_v32 = vsub.f32 %v30_v52, %v182_v5  ;;  %v4894_v52 = vld [vmem:[%s6824_s1 + $0x70] sm:$0xff] }
  0x11   :  { %v4874_v35 = vpack.c.bf16 %v236_v14, %v233_v13  ;;  %v4876_v39 = vsub.f32 %v47_v57, %v233_v13  ;;  %v4878_v40 = vsub.f32 %v48_v58, %v236_v14  ;;  %v4880_v41 = vpack.c.bf16 %v188_v17, %v185_v16 }
  0x12   :  { %7016 = vst [vmem:[#allocation9_spill] sm:$0xff] %v4862_v29  ;;  %v4883_v42 = vsub.f32 %v31_v63, %v185_v16  ;;  %v4885_v49 = vsub.f32 %v32_v0, %v188_v17  ;;  %v4887_v50 = vpack.c.bf16 %v242_v23, %v239_v18  ;;  %v4889_v51 = vsub.f32 %v49_v1, %v239_v18 }
  0x13   :  { %7017 = vst [vmem:[#allocation10_spill] sm:$0xff] %v4874_v35  ;;  %7018 = vst [vmem:[#allocation11_spill] sm:$0xff] %v4880_v41  ;;  %4043 = vmatpush3.bf16.msra.mxu1 %v4850_v9  ;;  %v4902_v55 = vsub.f32 %v50_v6, %v242_v23  ;;  %v4904_v56 = vpack.c.bf16 %v194_v27, %v191_v24  ;;  %v245_v57 = vand.u32 4294901760, %v51_v33  ;;  %v248_v58 = vand.u32 4294901760, %v52_v34 }
  0x14   :  { %7019 = vst [vmem:[#allocation12_spill] sm:$0xff] %v4887_v50  ;;  %4045 = vmatprep.subr.bf16.mxu1 %v4854_v11  ;;  %v4906_v63 = vsub.f32 %v33_v7, %v191_v24  ;;  %v4909_v0 = vshrl.u32 %v117_v19, 7  ;;  %v126_v1 = vunpack.c.0.s8 %v4762_v25  ;;  %v6828_v4 = vand.u32 4294901760, %v4753_v20  ;;  %v4922_v7 = vld [vmem:[%s6823_s0] sm:$0xff] }
  0x15   :  { %7020 = vst [vmem:[#allocation13_spill] sm:$0xff] %v4904_v56  ;;  %v4913_v5 = vsub.f32 %v34_v8, %v194_v27  ;;  %v4915_v13 = vpack.c.bf16 %v248_v58, %v245_v57  ;;  %v4925_v19 = vsub.f32 %v51_v33, %v245_v57  ;;  %v4927_v25 = vsub.f32 %v52_v34, %v248_v58 }
  0x16   :  { %7021 = vst [vmem:[#allocation14_spill] sm:$0xff] %v4909_v0  ;;  %v4930_v8 = vsub.s32 %v126_v1, %v4909_v0  ;;  %v382_v16 = vsub.f32 %v4753_v20, %v6828_v4  ;;  %v6829_v17 = vand.u32 4294901760, %v4765_v26  ;;  %v6832_v18 = vand.u32 4294901760, %v4768_v30 }
  0x17   :  { %7022 = vst [vmem:[#allocation15_spill] sm:$0xff] %v4915_v13  ;;  %4047 = vmatpush3.bf16.msra.mxu1 %v4862_v29  ;;  %v6835_v23 = vand.u32 4294901760, %v4776_v36  ;;  %v4092_v24 = vpack.c.bf16 %v4765_v26, %v4753_v20 }
  0x18   :  { %7023 = vst [vmem:[#allocation16_spill] sm:$0xff] %v4930_v8  ;;  %4049 = vmatprep.subr.bf16.mxu1 %v4874_v35 }
  0x19   :  { %9 = vsyncpa [#allocation3], 0  ;;  %v130_v27 = vrot.slane %v4922_v7, %v4930_v8  ;;  %v383_v33 = vand.u32 4294901760, %v382_v16  ;;  %v4094_v34 = vpack.c.bf16 %v4776_v36, %v4768_v30  ;;  %v6842_v57 = vand.u32 4294901760, %v4779_v37  ;;  %4093 = vmatprep.subr.bf16.mxu0 %v4092_v24 }
  0x1a   :  { %v389_v58 = vsub.f32 %v4765_v26, %v6829_v17  ;;  %v270_v1 = vsub.f32 %v4768_v30, %v6832_v18  ;;  %v277_v4 = vsub.f32 %v4776_v36, %v6835_v23  ;;  %v6845_v16 = vand.u32 4294901760, %v4792_v43 }
  0x1b   :  { %4051 = vmatpush3.bf16.msra.mxu1 %v4880_v41  ;;  %v138_v14 = vcombine.high %v130_v27, %v130_v27  ;;  %v4957_v6 = vand.u32 4294901760, %v130_v27  ;;  %4095 = vmatpush3.bf16.msra.mxu0 %v4094_v34  ;;  %v396_v17 = vsub.f32 %v4779_v37, %v6842_v57  ;;  %v6851_v0 = vand.u32 4294901760, %v4794_v44 }
  0x1c   :  { %4053 = vmatprep.subr.bf16.mxu1 %v4887_v50  ;;  %v390_v18 = vand.u32 4294901760, %v389_v58  ;;  %v271_v35 = vand.u32 4294901760, %v270_v1  ;;  %v278_v23 = vand.u32 4294901760, %v277_v4  ;;  %v403_v24 = vsub.f32 %v4792_v43, %v6845_v16 }
  0x1d   :  { %v7024_v41 = vand.u32 4294901760, %v4894_v52  ;;  %v7025_v29 = vand.u32 4294901760, %v4899_v54  ;;  %v4973_v11 = vand.u32 4294901760, %v138_v14  ;;  %v4976_v57 = vsub.f32 %v130_v27, %v4957_v6 }
  0x1e   :  { %v284_v58 = vsub.f32 %v4794_v44, %v6851_v0  ;;  %v4060_v4 = vpack.c.bf16 %v390_v18, %v383_v33  ;;  %v397_v1 = vand.u32 4294901760, %v396_v17  ;;  %v404_v50 = vand.u32 4294901760, %v403_v24 }
  0x1f   :  { %v4971_v34 = vpack.c.bf16 %v7025_v29, %v7024_v41  ;;  %v6850_v16 = vand.u32 4294901760, %v4796_v45  ;;  %4055 = vmatpush3.bf16.msra.mxu1 %v4904_v56  ;;  %v4984_v9 = vsub.f32 %v138_v14, %v4973_v11  ;;  %v6852_v29 = vand.u32 4294901760, %v4976_v57 }
  0x20   :  { %v4062_v41 = vpack.c.bf16 %v278_v23, %v271_v35  ;;  %v4096_v27 = vpack.c.bf16 %v4792_v43, %v4779_v37  ;;  %4057 = vmatprep.subr.bf16.mxu1 %v4915_v13  ;;  %v285_v61 = vand.u32 4294901760, %v284_v58  ;;  %v4098_v18 = vpack.c.bf16 %v4796_v45, %v4794_v44 }
  0x21   :  { %7026 = vst [vmem:[#allocation17_spill] sm:$0xff] %v4971_v34  ;;  %v291_v17 = vsub.f32 %v4796_v45, %v6850_v16  ;;  %v6853_v33 = vand.u32 4294901760, %v4800_v47  ;;  %v259_v35 = vsub.f32 %v4976_v57, %v6852_v29  ;;  %v6861_v23 = vand.u32 4294901760, %v4802_v48  ;;  %628 = vmatprep.mubr.f32.mxu0 %v4984_v9 }
  0x22   :  { %4097 = vmatprep.subr.bf16.mxu0 %v4096_v27  ;;  %v4064_v58 = vpack.c.bf16 %v404_v50, %v397_v1  ;;  %v4100_v14 = vpack.c.bf16 %v4802_v48, %v4800_v47  ;;  %v7027_v27 = vand.u32 4294901760, %v4984_v9  ;;  %v7028_v1 = vand.u32 4294901760, %v4820_v59 }
  0x23   :  { %4099 = vmatpush3.bf16.msra.mxu0 %v4098_v18  ;;  %v410_v16 = vsub.f32 %v4800_v47, %v6853_v33  ;;  %4059 = vmatpush3.bf16.msra.mxu1 %v4971_v34  ;;  %v292_v24 = vand.u32 4294901760, %v291_v17  ;;  %v417_v50 = vsub.f32 %v4802_v48, %v6861_v23  ;;  %v260_v33 = vand.u32 4294901760, %v259_v35 }
  0x24   :  { %v253_v29 = vsub.f32 %v4984_v9, %v7027_v27  ;;  %v298_v18 = vsub.f32 %v4820_v59, %v7028_v1  ;;  %4061 = vmatprep.subr.bf16.mxu1 %v4060_v4  ;;  %v7029_v13 = vand.u32 4294901760, %v4822_v60  ;;  %4101 = vmatprep.subr.bf16.mxu0 %v4100_v14  ;;  %v4102_v27 = vpack.c.bf16 %v4822_v60, %v4820_v59 }
  0x25   :  { %v411_v0 = vand.u32 4294901760, %v410_v16  ;;  %v418_v56 = vand.u32 4294901760, %v417_v50  ;;  %v6865_v23 = vand.u32 4294901760, %v4826_v62  ;;  %v6864_v1 = vand.u32 4294901760, %v4837_v2 }
  0x26   :  { %v305_v34 = vsub.f32 %v4822_v60, %v7029_v13  ;;  %v254_v17 = vand.u32 4294901760, %v253_v29  ;;  %v299_v8 = vand.u32 4294901760, %v298_v18  ;;  %v6866_v4 = vand.u32 4294901760, %v4839_v3 }
  0x27   :  { %4103 = vmatpush3.bf16.msra.mxu0 %v4102_v27  ;;  %v6867_v16 = vand.u32 4294901760, %v4852_v10  ;;  %v7030_v35 = vand.u32 4294901760, %v4894_v52  ;;  %v424_v29 = vsub.f32 %v4826_v62, %v6865_v23  ;;  %v4106_v14 = vpack.c.bf16 %v4852_v10, %v4839_v3 }
  0x28   :  { %v306_v53 = vand.u32 4294901760, %v305_v34  ;;  %255 = vmatprep.mubr.f32.mxu1 %v254_v17  ;;  %v4104_v34 = vpack.c.bf16 %v4837_v2, %v4826_v62  ;;  %v4066_v50 = vpack.c.bf16 %v292_v24, %v285_v61  ;;  %v431_v18 = vsub.f32 %v4837_v2, %v6864_v1 }
  0x29   :  { %v5031_v13 = vsub.f32 %v4894_v52, %v7030_v35  ;;  %261 = vmatmul.mubr.f32.vlgmr.msra.gmra.mrb[0].mxu1 %v260_v33  ;;  %v312_v52 = vsub.f32 %v4839_v3, %v6866_v4  ;;  %v319_v27 = vsub.f32 %v4852_v10, %v6867_v16  ;;  %v425_v17 = vand.u32 4294901760, %v424_v29 }
  0x2a   :  { %4063 = vmatpush3.bf16.msra.mxu1 %v4062_v41  ;;  %4105 = vmatprep.subr.bf16.mxu0 %v4104_v34  ;;  %v6870_v35 = vand.u32 4294901760, %v4856_v12  ;;  %v6869_v33 = vand.u32 4294901760, %v4860_v28  ;;  %v6868_v61 = vand.u32 4294901760, %v4864_v31  ;;  %v4068_v24 = vpack.c.bf16 %v418_v56, %v411_v0 }
  0x2b   :  { %7031 = vst [vmem:[#allocation18_spill] sm:$0xff] %v5031_v13  ;;  %4065 = vmatprep.subr.bf16.mxu1 %v4064_v58  ;;  %v4070_v1 = vpack.c.bf16 %v306_v53, %v299_v8  ;;  %v432_v23 = vand.u32 4294901760, %v431_v18  ;;  %4107 = vmatpush3.bf16.msra.mxu0 %v4106_v14  ;;  %v6871_v4 = vand.u32 4294901760, %v4866_v32  ;;  %v4108_v56 = vpack.c.bf16 %v4860_v28, %v4856_v12 }
  0x2c   :  { %v438_v16 = vsub.f32 %v4856_v12, %v6870_v35  ;;  %v445_v41 = vsub.f32 %v4860_v28, %v6869_v33  ;;  %v326_v29 = vsub.f32 %v4864_v31, %v6868_v61  ;;  %491 = vmatprep.mubr.f32.mxu1 %v4973_v11  ;;  %v313_v53 = vand.u32 4294901760, %v312_v52 }
  0x2d   :  { %v320_v0 = vand.u32 4294901760, %v319_v27  ;;  %v333_v8 = vsub.f32 %v4866_v32, %v6871_v4  ;;  %v4110_v58 = vpack.c.bf16 %v4866_v32, %v4864_v31  ;;  %v4072_v34 = vpack.c.bf16 %v432_v23, %v425_v17  ;;  %4109 = vmatprep.subr.bf16.mxu0 %v4108_v56 }
  0x2e   :  { %4067 = vmatpush3.bf16.msra.mxu1 %v4066_v50  ;;  %v439_v14 = vand.u32 4294901760, %v438_v16  ;;  %v446_v18 = vand.u32 4294901760, %v445_v41  ;;  %v6874_v61 = vand.u32 4294901760, %v4876_v39  ;;  %v327_v33 = vand.u32 4294901760, %v326_v29 }
  0x2f   :  { %4069 = vmatprep.subr.bf16.mxu1 %v4068_v24  ;;  %4111 = vmatpush3.bf16.msra.mxu0 %v4110_v58  ;;  %v6872_v52 = vand.u32 4294901760, %v4878_v40  ;;  %v6873_v27 = vand.u32 4294901760, %v4883_v42  ;;  %v6875_v35 = vand.u32 4294901760, %v4885_v49  ;;  %v334_v4 = vand.u32 4294901760, %v333_v8 }
  0x30   :  { %v452_v50 = vsub.f32 %v4876_v39, %v6874_v61  ;;  %v4112_v23 = vpack.c.bf16 %v4878_v40, %v4876_v39  ;;  %v4114_v16 = vpack.c.bf16 %v4885_v49, %v4883_v42  ;;  %v4074_v17 = vpack.c.bf16 %v320_v0, %v313_v53 }
  0x31   :  { %v459_v24 = vsub.f32 %v4878_v40, %v6872_v52  ;;  %v340_v41 = vsub.f32 %v4883_v42, %v6873_v27  ;;  %v347_v29 = vsub.f32 %v4885_v49, %v6875_v35  ;;  %v6879_v8 = vand.u32 4294901760, %v4889_v51 }
  0x32   :  { %4071 = vmatpush3.bf16.msra.mxu1 %v4070_v1  ;;  %v453_v56 = vand.u32 4294901760, %v452_v50  ;;  %4113 = vmatprep.subr.bf16.mxu0 %v4112_v23  ;;  %v6876_v58 = vand.u32 4294901760, %v4902_v55  ;;  %v7032_v0 = vand.u32 4294901760, %v4899_v54  ;;  %v4076_v27 = vpack.c.bf16 %v446_v18, %v439_v14 }
  0x33   :  { %4073 = vmatprep.subr.bf16.mxu1 %v4072_v34  ;;  %v460_v61 = vand.u32 4294901760, %v459_v24  ;;  %4115 = vmatpush3.bf16.msra.mxu0 %v4114_v16  ;;  %v6878_v35 = vand.u32 4294901760, %v4913_v5  ;;  %v4078_v1 = vpack.c.bf16 %v334_v4, %v327_v33  ;;  %v466_v50 = vsub.f32 %v4889_v51, %v6879_v8 }
  0x34   :  { %v5096_v52 = vsub.f32 %v4899_v54, %v7032_v0  ;;  %v473_v23 = vsub.f32 %v4902_v55, %v6876_v58  ;;  %v4116_v53 = vpack.c.bf16 %v4902_v55, %v4889_v51  ;;  %v341_v54 = vand.u32 4294901760, %v340_v41 }
  0x35   :  { %v348_v0 = vand.u32 4294901760, %v347_v29  ;;  %v7033_v34 = vand.u32 4294901760, %v4906_v63  ;;  %v4118_v4 = vpack.c.bf16 %v4913_v5, %v4906_v63  ;;  %v4080_v33 = vpack.c.bf16 %v460_v61, %v453_v56 }
  0x36   :  { %4075 = vmatpush3.bf16.msra.mxu1 %v4074_v17  ;;  %v467_v18 = vand.u32 4294901760, %v466_v50  ;;  %v361_v16 = vsub.f32 %v4913_v5, %v6878_v35  ;;  %4117 = vmatprep.subr.bf16.mxu0 %v4116_v53  ;;  %v6877_v24 = vand.u32 4294901760, %v4925_v19  ;;  %v474_v41 = vand.u32 4294901760, %v473_v23 }
  0x37   :  { %v354_v14 = vsub.f32 %v4906_v63, %v7033_v34  ;;  %4077 = vmatprep.subr.bf16.mxu1 %v4076_v27  ;;  %4119 = vmatpush3.bf16.msra.mxu0 %v4118_v4  ;;  %v6880_v29 = vand.u32 4294901760, %v4927_v25  ;;  %v6881_v34 = vand.u32 4294901760, %v5031_v13  ;;  %v6883_v58 = vand.u32 4294901760, %v5096_v52 }
  0x38   :  { %v480_v61 = vsub.f32 %v4925_v19, %v6877_v24  ;;  %v4120_v17 = vpack.c.bf16 %v4927_v25, %v4925_v19  ;;  %v4122_v56 = vpack.c.bf16 %v5096_v52, %v5031_v13  ;;  %v4082_v53 = vpack.c.bf16 %v348_v0, %v341_v54 }
  0x39   :  { %v355_v27 = vand.u32 4294901760, %v354_v14  ;;  %v487_v50 = vsub.f32 %v4927_v25, %v6880_v29  ;;  %v362_v23 = vand.u32 4294901760, %v361_v16  ;;  %v368_v4 = vsub.f32 %v5031_v13, %v6881_v34 }
  0x3a   :  { %4079 = vmatpush3.bf16.msra.mxu1 %v4078_v1  ;;  %v375_v24 = vsub.f32 %v5096_v52, %v6883_v58  ;;  %4121 = vmatprep.subr.bf16.mxu0 %v4120_v17  ;;  %v7034_v35 = vand.u32 4294901760, %v4753_v20  ;;  %v7035_v54 = vand.u32 4294901760, %v4765_v26  ;;  %v4084_v14 = vpack.c.bf16 %v474_v41, %v467_v18 }
  0x3b   :  { %4081 = vmatprep.subr.bf16.mxu1 %v4080_v33  ;;  %v481_v8 = vand.u32 4294901760, %v480_v61  ;;  %v488_v29 = vand.u32 4294901760, %v487_v50  ;;  %4123 = vmatpush3.bf16.msra.mxu0 %v4122_v56  ;;  %v7036_v1 = vand.u32 4294901760, %v4768_v30  ;;  %v7037_v16 = vand.u32 4294901760, %v4776_v36  ;;  %v5207_v50 = vld [vmem:[%s6824_s1 + $0x188] sm:$0xff] }
  0x3c   :  { %v4156_v0 = vpack.c.bf16 %v7035_v54, %v7034_v35  ;;  %v7038_v13 = vand.u32 4294901760, %v4779_v37  ;;  %v7039_v17 = vand.u32 4294901760, %v4792_v43  ;;  %v4086_v20 = vpack.c.bf16 %v362_v23, %v355_v27 }
  0x3d   :  { %v4158_v34 = vpack.c.bf16 %v7037_v16, %v7036_v1  ;;  %v369_v26 = vand.u32 4294901760, %v368_v4  ;;  %v376_v35 = vand.u32 4294901760, %v375_v24  ;;  %v4088_v33 = vpack.c.bf16 %v488_v29, %v481_v8  ;;  %v7063_v4 = vld [vmem:[#allocation6_spill] sm:$0xff] }
  0x3e   :  { %4157 = vmatprep.subr.bf16.mxu0 %v4156_v0  ;;  %v4160_v58 = vpack.c.bf16 %v7039_v17, %v7038_v13  ;;  %4083 = vmatpush3.bf16.msra.mxu1 %v4082_v53  ;;  %v7040_v30 = vand.u32 4294901760, %v4794_v44  ;;  %v7041_v36 = vand.u32 4294901760, %v4796_v45  ;;  %v7042_v37 = vand.u32 4294901760, %v4800_v47 }
  0x3f   :  { %631 = vmatmul.mubr.f32.vlgmr.msra.gmra.mrb[0].mxu0 %v4976_v57  ;;  %4085 = vmatprep.subr.bf16.mxu1 %v4084_v14  ;;  %v7043_v43 = vand.u32 4294901760, %v4802_v48  ;;  %v4090_v24 = vpack.c.bf16 %v376_v35, %v369_v26  ;;  %v7044_v8 = vand.u32 4294901760, %v4820_v59  ;;  %v7045_v41 = vand.u32 4294901760, %v4822_v60  ;;  %v7068_v26 = vld [vmem:[#allocation7_spill] sm:$0xff]  ;;  %v7069_v35 = vld [vmem:[#allocation8_spill] sm:$0xff] }
  0x40   :  { %4159 = vmatpush3.bf16.msra.mxu0 %v4158_v34  ;;  %v4162_v18 = vpack.c.bf16 %v7041_v36, %v7040_v30  ;;  %905 = vmatprep.mubr.f32.mxu0 %v4973_v11  ;;  %v7046_v45 = vand.u32 4294901760, %v4826_v62  ;;  %v7048_v48 = vand.u32 4294901760, %v4839_v3  ;;  %v7049_v29 = vand.u32 4294901760, %v4852_v10 }
  0x41   :  { %4161 = vmatprep.subr.bf16.mxu0 %v4160_v58  ;;  %v4164_v13 = vpack.c.bf16 %v7043_v43, %v7042_v37  ;;  %v4166_v44 = vpack.c.bf16 %v7045_v41, %v7044_v8  ;;  %v7047_v58 = vand.u32 4294901760, %v4837_v2  ;;  %v7050_v59 = vand.u32 4294901760, %v4856_v12 }
  0x42   :  { %4087 = vmatpush3.bf16.msra.mxu1 %v4086_v20  ;;  %v4170_v34 = vpack.c.bf16 %v7049_v29, %v7048_v48  ;;  %v7051_v60 = vand.u32 4294901760, %v4860_v28  ;;  %v7052_v62 = vand.u32 4294901760, %v4984_v9  ;;  %v7053_v2 = vand.u32 4294901760, %v4864_v31  ;;  %v5227_v20 = vld [vmem:[%s6824_s1 + $0x100] sm:$0xff]  ;;  %v7075_v29 = vld [vmem:[#allocation10_spill] sm:$0xff] }
  0x43   :  { %4089 = vmatprep.subr.bf16.mxu1 %v4088_v33  ;;  %v4168_v47 = vpack.c.bf16 %v7047_v58, %v7046_v45  ;;  %v7054_v3 = vand.u32 4294901760, %v4866_v32  ;;  %v7055_v12 = vand.u32 4294901760, %v4876_v39  ;;  %v7056_v28 = vand.u32 4294901760, %v4878_v40  ;;  %v7070_v33 = vld [vmem:[#allocation18_spill] sm:$0xff]  ;;  %v5277_v45 = vld [vmem:[%s6824_s1 + $0x1a0] sm:$0xff] }
  0x44   :  { %4163 = vmatpush3.bf16.msra.mxu0 %v4162_v18  ;;  %v4172_v61 = vpack.c.bf16 %v7051_v60, %v7050_v59  ;;  %v123_v53 = vcombine.high %v4922_v7, %v4922_v7  ;;  %v7057_v9 = vand.u32 4294901760, %v4883_v42  ;;  %v7058_v31 = vand.u32 4294901760, %v4885_v49  ;;  %v5202_v7 = vld [vmem:[%s6824_s1 + $0x180] sm:$0xff]  ;;  %v5282_v58 = vld [vmem:[%s6824_s1 + $0x1a8] sm:$0xff] }
  0x45   :  { %4165 = vmatprep.subr.bf16.mxu0 %v4164_v13  ;;  %v4174_v10 = vpack.c.bf16 %v7054_v3, %v7053_v2  ;;  %v4176_v56 = vpack.c.bf16 %v7056_v28, %v7055_v12  ;;  %v7059_v27 = vand.u32 4294901760, %v4889_v51  ;;  %v7060_v39 = vand.u32 4294901760, %v4902_v55  ;;  %v7061_v42 = vld [vmem:[#allocation5_spill] sm:$0xff]  ;;  %v7062_v49 = vld [vmem:[#allocation16_spill] sm:$0xff]  ;;  %v5320_v28 = vld [vmem:[%s6824_s1 + $0x1b0] sm:$0xff] }
  0x46   :  { %4091 = vmatpush3.bf16.msra.mxu1 %v4090_v24  ;;  %v4178_v32 = vpack.c.bf16 %v7058_v31, %v7057_v9  ;;  %v5211_v23 = vrot.slane %v123_v53, %v7062_v49  ;;  %v7064_v51 = vand.u32 4294901760, %v4906_v63  ;;  %v7065_v55 = vand.u32 4294901760, %v4913_v5  ;;  %v5232_v63 = vld [vmem:[%s6824_s1 + $0x108] sm:$0xff]  ;;  %v5237_v5 = vld [vmem:[%s6824_s1 + $0x190] sm:$0xff]  ;;  %v7078_v31 = vld [vmem:[#allocation12_spill] sm:$0xff] }
  0x47   :  { %4125 = vmatprep.subr.bf16.mxu1 %v4742_v15  ;;  %v4180_v40 = vpack.c.bf16 %v7060_v39, %v7059_v27  ;;  %v7066_v0 = vand.u32 4294901760, %v4925_v19  ;;  %v7067_v14 = vand.u32 4294901760, %v4927_v25  ;;  %v1065_v16 = vand.u32 4294901760, %v5202_v7  ;;  %v5242_v19 = vld [vmem:[%s6824_s1 + $0x198] sm:$0xff]  ;;  %v7074_v48 = vld [vmem:[#allocation9_spill] sm:$0xff] }
  0x48   :  { %4167 = vmatpush3.bf16.msra.mxu0 %v4166_v44  ;;  %v4182_v54 = vpack.c.bf16 %v7065_v55, %v7064_v51  ;;  %v6901_v17 = vand.u32 4294901760, %v5207_v50  ;;  %v139_v25 = vcombine.high %v5211_v23, %v5211_v23  ;;  %v7071_v30 = vand.u32 4294901760, %v7070_v33  ;;  %v5272_v44 = vld [vmem:[%s6824_s1 + $0x118] sm:$0xff]  ;;  %v5315_v12 = vld [vmem:[%s6824_s1 + $0x128] sm:$0xff] }
  0x49   :  { %4169 = vmatprep.subr.bf16.mxu0 %v4168_v47  ;;  %493 = vmatmul.mubr.f32.vlgmr.msra.gmra.mrb[2].mxu1 %v4957_v6  ;;  %v4184_v1 = vpack.c.bf16 %v7067_v14, %v7066_v0  ;;  %v7072_v36 = vand.u32 4294901760, %v5096_v52  ;;  %v6900_v37 = vand.u32 4294901760, %v5227_v20  ;;  %v6897_v43 = vand.u32 4294901760, %v5232_v63  ;;  %v5267_v52 = vld [vmem:[%s6824_s1 + $0x110] sm:$0xff]  ;;  %v5359_v0 = vld [vmem:[%s6824_s1 + $0x138] sm:$0xff]  ;;  %v5364_v14 = vld [vmem:[%s6824_s1 + $0x1c0] sm:$0xff] }
  0x4a   :  { %4127 = vmatpush3.bf16.msra.mxu1 %v4755_v21  ;;  %735 = vmatprep.mubr.f32.mxu1 %v7052_v62  ;;  %v5254_v13 = vand.u32 4294901760, %v139_v25  ;;  %v5260_v24 = vpack.c.bf16 %v6901_v17, %v1065_v16  ;;  %v6894_v8 = vand.u32 4294901760, %v5237_v5  ;;  %v6893_v41 = vand.u32 4294901760, %v5242_v19  ;;  %v7077_v9 = vld [vmem:[#allocation11_spill] sm:$0xff] }
  0x4b   :  { %4129 = vmatprep.subr.bf16.mxu1 %v4757_v22  ;;  %v4186_v18 = vpack.c.bf16 %v7072_v36, %v7071_v30  ;;  %v6892_v59 = vand.u32 4294901760, %v5267_v52  ;;  %v6891_v60 = vand.u32 4294901760, %v5272_v44  ;;  %v6890_v2 = vand.u32 4294901760, %v5277_v45  ;;  %v7082_v33 = vld [vmem:[#allocation15_spill] sm:$0xff] }
  0x4c   :  { %4171 = vmatpush3.bf16.msra.mxu0 %v4170_v34  ;;  %v5285_v47 = vsub.f32 %v139_v25, %v5254_v13  ;;  %v5293_v34 = vpack.c.bf16 %v6897_v43, %v6900_v37  ;;  %v5303_v62 = vpack.c.bf16 %v6893_v41, %v6894_v8  ;;  %v6887_v3 = vand.u32 4294901760, %v5282_v58  ;;  %v7081_v25 = vld [vmem:[#allocation13_spill] sm:$0xff]  ;;  %v5490_v17 = vld [vmem:[%s6824_s1 + $0x1f0] sm:$0xff] }
  0x4d   :  { %4173 = vmatprep.subr.bf16.mxu0 %v4172_v61  ;;  %v6885_v39 = vand.u32 4294901760, %v5315_v12  ;;  %v6889_v51 = vand.u32 4294901760, %v5320_v28  ;;  %v7088_v43 = vand.u32 4294901760, %v4976_v57  ;;  %v5456_v37 = vand.u32 4294901760, %v5211_v23 }
  0x4e   :  { %4131 = vmatpush3.bf16.msra.mxu1 %v4781_v38  ;;  %7073 = vst [vmem:[#allocation5_spill] sm:$0xff] %v5285_v47  ;;  %v6884_v61 = vand.u32 4294901760, %v5285_v47  ;;  %7076 = vst [vmem:[#allocation16_spill] sm:$0xff] %v5303_v62  ;;  %v5347_v49 = vpack.c.bf16 %v6887_v3, %v6890_v2  ;;  %v5404_v3 = vld [vmem:[%s6824_s1 + $0x1d0] sm:$0xff]  ;;  %vm2740_vm0 = vcmask 254976   ;;  %vm4687_vm1 = vmmov 0  }
  0x4f   :  { %4133 = vmatprep.subr.bf16.mxu1 %v4798_v46  ;;  %vm2774_vm2 = vcmask 261120  }
  0x50   :  { %4175 = vmatpush3.bf16.msra.mxu0 %v4174_v10  ;;  %v5310_v10 = vld [vmem:[%s6824_s1 + $0x120] sm:$0xff]  ;;  %v1115_v53 = vsub.f32 %v5285_v47, %v6884_v61  ;;  %7080 = vst [vmem:[#allocation7_spill] sm:$0xff] %v5347_v49 }
  0x51   :  { %4177 = vmatprep.subr.bf16.mxu0 %v4176_v56  ;;  %v5325_v56 = vld [vmem:[%s6824_s1 + $0x1b8] sm:$0xff]  ;;  %v6886_v27 = vand.u32 4294901760, %v5310_v10 }
  0x52   :  { %4135 = vmatpush3.bf16.msra.mxu1 %v7061_v42  ;;  %v6888_v55 = vand.u32 4294901760, %v5325_v56 }
  0x53   :  { %4137 = vmatprep.subr.bf16.mxu1 %v7063_v4  ;;  %v5378_v30 = vpack.c.bf16 %v6885_v39, %v6886_v27  ;;  %v5394_v39 = vld [vmem:[%s6824_s1 + $0x140] sm:$0xff]  ;;  %v5399_v27 = vld [vmem:[%s6824_s1 + $0x148] sm:$0xff] }
  0x54   :  { %4179 = vmatpush3.bf16.msra.mxu0 %v4178_v32  ;;  %v5338_v32 = vpack.c.bf16 %v6891_v60, %v6892_v59  ;;  %v6903_v60 = vand.u32 4294901760, %v5394_v39  ;;  %v6902_v59 = vand.u32 4294901760, %v5399_v27 }
  0x55   :  { %4181 = vmatprep.subr.bf16.mxu0 %v4180_v40  ;;  %v1116_v40 = vand.u32 4294901760, %v1115_v53  ;;  %7083 = vst [vmem:[#allocation8_spill] sm:$0xff] %v5378_v30  ;;  %v5387_v53 = vpack.c.bf16 %v6888_v55, %v6889_v51  ;;  %v5409_v55 = vld [vmem:[%s6824_s1 + $0x1d8] sm:$0xff]  ;;  %v7085_v51 = vld [vmem:[#allocation17_spill] sm:$0xff] }
  0x56   :  { %4139 = vmatpush3.bf16.msra.mxu1 %v7068_v26  ;;  %7079 = vst [vmem:[#allocation6_spill] sm:$0xff] %v5338_v32  ;;  %v6904_v8 = vand.u32 4294901760, %v5409_v55  ;;  %v5464_v57 = vpack.c.bf16 %v6902_v59, %v6903_v60  ;;  %v5480_v59 = vld [vmem:[%s6824_s1 + $0x160] sm:$0xff]  ;;  %v5485_v60 = vld [vmem:[%s6824_s1 + $0x168] sm:$0xff] }
  0x57   :  { %4141 = vmatprep.subr.bf16.mxu1 %v7069_v35  ;;  %7084 = vst [vmem:[#allocation18_spill] sm:$0xff] %v5387_v53 }
  0x58   :  { %4183 = vmatpush3.bf16.msra.mxu0 %v4182_v54  ;;  %v5354_v54 = vld [vmem:[%s6824_s1 + $0x130] sm:$0xff]  ;;  %7089 = vst [vmem:[#allocation11_spill] sm:$0xff] %v5464_v57 }
  0x59   :  { %4185 = vmatprep.subr.bf16.mxu0 %v4184_v1  ;;  %v5369_v1 = vld [vmem:[%s6824_s1 + $0x1c8] sm:$0xff]  ;;  %v6896_v36 = vand.u32 4294901760, %v5354_v54 }
  0x5a   :  { %4143 = vmatpush3.bf16.msra.mxu1 %v7074_v48  ;;  %v6898_v61 = vand.u32 4294901760, %v5369_v1 }
  0x5b   :  { %4145 = vmatprep.subr.bf16.mxu1 %v7075_v29 }
  0x5c   :  { %4187 = vmatpush3.bf16.msra.mxu0 %v4186_v18  ;;  %v6895_v18 = vand.u32 4294901760, %v5359_v0 }
  0x5d   :  { %4221 = vmatprep.subr.bf16.mxu0 %v5260_v24 }
  0x5e   :  { %4147 = vmatpush3.bf16.msra.mxu1 %v7077_v9  ;;  %v5418_v2 = vpack.c.bf16 %v6895_v18, %v6896_v36  ;;  %v5434_v18 = vld [vmem:[%s6824_s1 + $0x150] sm:$0xff]  ;;  %v5439_v36 = vld [vmem:[%s6824_s1 + $0x158] sm:$0xff] }
  0x5f   :  { %907 = vmatmul.mubr.f32.vlgmr.msra.gmra.mrb[2].mxu0 %v4957_v6  ;;  %4149 = vmatprep.subr.bf16.mxu1 %v7078_v31 }
  0x60   :  { %4223 = vmatpush3.bf16.msra.mxu0 %v5293_v34  ;;  %1117 = vmatprep.mubr.f32.mxu0 %v1116_v40  ;;  %v6899_v40 = vand.u32 4294901760, %v5364_v14  ;;  %7086 = vst [vmem:[#allocation9_spill] sm:$0xff] %v5418_v2 }
  0x61   :  { %4225 = vmatprep.subr.bf16.mxu0 %v5303_v62 }
  0x62   :  { %4151 = vmatpush3.bf16.msra.mxu1 %v7081_v25  ;;  %v5427_v41 = vpack.c.bf16 %v6898_v61, %v6899_v40  ;;  %v5446_v61 = vld [vmem:[%s6824_s1 + $0x1e0] sm:$0xff]  ;;  %v5451_v40 = vld [vmem:[%s6824_s1 + $0x1e8] sm:$0xff] }
  0x63   :  { %4153 = vmatprep.subr.bf16.mxu1 %v7082_v33 }
  0x64   :  { %4227 = vmatpush3.bf16.msra.mxu0 %v5338_v32  ;;  %7087 = vst [vmem:[#allocation10_spill] sm:$0xff] %v5427_v41  ;;  %v7102_v32 = vand.u32 4294901760, %v5272_v44 }
  0x65   :  { %4229 = vmatprep.subr.bf16.mxu0 %v5347_v49 }
  0x66   :  { %4155 = vmatpush3.bf16.msra.mxu1 %v7085_v51 }
  0x67   :  { %4189 = vmatprep.subr.bf16.mxu1 %v4742_v15  ;;  %v6905_v15 = vand.u32 4294901760, %v5404_v3 }
  0x68   :  { %4231 = vmatpush3.bf16.msra.mxu0 %v5378_v30  ;;  %v7101_v30 = vand.u32 4294901760, %v5267_v52 }
  0x69   :  { %4233 = vmatprep.subr.bf16.mxu0 %v5387_v53  ;;  %739 = vmatmul.mubr.f32.vlgmr.msra.gmra.mrb[4].mxu1 %v7088_v43  ;;  %v1047_v43 = vand.u32 4294901760, %v5434_v18 }
  0x6a   :  { %4191 = vmatpush3.bf16.msra.mxu1 %v4755_v21  ;;  %1009 = vmatprep.mubr.f32.mxu1 %v4973_v11  ;;  %v5473_v21 = vpack.c.bf16 %v6904_v8, %v6905_v15  ;;  %v5495_v8 = vld [vmem:[%s6824_s1 + $0x1f8] sm:$0xff]  ;;  %v5500_v15 = vsub.f32 %v5202_v7, %v1065_v16  ;;  %v5505_v11 = vsub.f32 %v5211_v23, %v5456_v37  ;;  %v1053_v7 = vand.u32 4294901760, %v5480_v59 }
  0x6b   :  { %4193 = vmatprep.subr.bf16.mxu1 %v4757_v22  ;;  %v7091_v22 = vand.u32 4294901760, %v5207_v50  ;;  %v7094_v23 = vand.u32 4294901760, %v5227_v20  ;;  %v5562_v49 = vsub.f32 %v5267_v52, %v7101_v30  ;;  %v7105_v30 = vand.u32 4294901760, %v5310_v10 }
  0x6c   :  { %4235 = vmatpush3.bf16.msra.mxu0 %v5418_v2  ;;  %7090 = vst [vmem:[#allocation12_spill] sm:$0xff] %v5473_v21  ;;  %v7092_v2 = vand.u32 4294901760, %v5439_v36  ;;  %v7117_v52 = vand.u32 4294901760, %v5369_v1 }
  0x6d   :  { %4237 = vmatprep.subr.bf16.mxu0 %v5427_v41  ;;  %v5510_v41 = vsub.f32 %v5207_v50, %v7091_v22  ;;  %v5523_v16 = vsub.f32 %v5227_v20, %v7094_v23  ;;  %v7095_v50 = vand.u32 4294901760, %v5446_v61  ;;  %v5542_v20 = vld [vmem:[%s6824_s1 + $0x178] sm:$0xff]  ;;  %v7098_v23 = vand.u32 4294901760, %v5232_v63 }
  0x6e   :  { %4195 = vmatpush3.bf16.msra.mxu1 %v4781_v38  ;;  %v5516_v53 = vpack.c.bf16 %v7092_v2, %v1047_v43  ;;  %v5537_v38 = vld [vmem:[%s6824_s1 + $0x170] sm:$0xff] }
  0x6f   :  { %4197 = vmatprep.subr.bf16.mxu1 %v4798_v46  ;;  %v7096_v46 = vand.u32 4294901760, %v5451_v40 }
  0x70   :  { %4239 = vmatpush3.bf16.msra.mxu0 %v5464_v57  ;;  %7093 = vst [vmem:[#allocation13_spill] sm:$0xff] %v5516_v53  ;;  %v7100_v57 = vand.u32 4294901760, %v5242_v19 }
  0x71   :  { %4241 = vmatprep.subr.bf16.mxu0 %v5473_v21  ;;  %v5530_v22 = vpack.c.bf16 %v7096_v46, %v7095_v50  ;;  %v5547_v21 = vsub.f32 %v5232_v63, %v7098_v23  ;;  %v7099_v50 = vand.u32 4294901760, %v5237_v5  ;;  %v5567_v63 = vsub.f32 %v5272_v44, %v7102_v32 }
  0x72   :  { %v5557_v2 = vsub.f32 %v5242_v19, %v7100_v57  ;;  %4199 = vmatpush3.bf16.msra.mxu1 %v7061_v42  ;;  %v7104_v19 = vand.u32 4294901760, %v5282_v58  ;;  %v7106_v42 = vand.u32 4294901760, %v5485_v60  ;;  %v7108_v32 = vand.u32 4294901760, %v5315_v12 }
  0x73   :  { %7097 = vst [vmem:[#allocation15_spill] sm:$0xff] %v5530_v22  ;;  %v5552_v46 = vsub.f32 %v5237_v5, %v7099_v50  ;;  %v7103_v5 = vand.u32 4294901760, %v5277_v45  ;;  %v5584_v50 = vsub.f32 %v5310_v10, %v7105_v30  ;;  %4201 = vmatprep.subr.bf16.mxu1 %v7063_v4  ;;  %v7109_v10 = vand.u32 4294901760, %v5320_v28 }
  0x74   :  { %v5578_v57 = vsub.f32 %v5282_v58, %v7104_v19  ;;  %4243 = vmatpush3.bf16.msra.mxu0 %v5516_v53  ;;  %v5590_v44 = vpack.c.bf16 %v7106_v42, %v1053_v7  ;;  %v7110_v4 = vand.u32 4294901760, %v5325_v56  ;;  %v7111_v42 = vand.u32 4294901760, %v5490_v17 }
  0x75   :  { %v5573_v23 = vsub.f32 %v5277_v45, %v7103_v5  ;;  %v5597_v5 = vsub.f32 %v5315_v12, %v7108_v32  ;;  %v5602_v19 = vsub.f32 %v5320_v28, %v7109_v10  ;;  %4245 = vmatprep.subr.bf16.mxu0 %v5530_v22  ;;  %v7112_v58 = vand.u32 4294901760, %v5495_v8 }
  0x76   :  { %7107 = vst [vmem:[#allocation17_spill] sm:$0xff] %v5590_v44  ;;  %v5607_v30 = vsub.f32 %v5325_v56, %v7110_v4  ;;  %v7114_v12 = vand.u32 4294901760, %v5354_v54  ;;  %v7115_v28 = vand.u32 4294901760, %v5359_v0  ;;  %v7116_v56 = vand.u32 4294901760, %v5364_v14  ;;  %4203 = vmatpush3.bf16.msra.mxu1 %v7068_v26 }
  0x77   :  { %v5614_v45 = vpack.c.bf16 %v7112_v58, %v7111_v42  ;;  %v5634_v58 = vsub.f32 %v5369_v1, %v7117_v52  ;;  %4205 = vmatprep.subr.bf16.mxu1 %v7069_v35  ;;  %v7120_v1 = vand.u32 4294901760, %v5399_v27  ;;  %v7121_v26 = vand.u32 4294901760, %v5404_v3 }
  0x78   :  { %v5619_v32 = vsub.f32 %v5354_v54, %v7114_v12  ;;  %v5624_v10 = vsub.f32 %v5359_v0, %v7115_v28  ;;  %v5629_v4 = vsub.f32 %v5364_v14, %v7116_v56  ;;  %v7118_v54 = vand.u32 4294901760, %v5394_v39  ;;  %4247 = vmatpush3.bf16.msra.mxu0 %v5590_v44 }
  0x79   :  { %7113 = vst [vmem:[#allocation19_spill] sm:$0xff] %v5614_v45  ;;  %v6922_v0 = vand.u32 4294901760, %v5500_v15  ;;  %v7119_v28 = vand.u32 4294901760, %v5505_v11  ;;  %v5651_v52 = vsub.f32 %v5399_v27, %v7120_v1  ;;  %v7122_v56 = vand.u32 4294901760, %v5537_v38  ;;  %4249 = vmatprep.subr.bf16.mxu0 %v5614_v45 }
  0x7a   :  { %v5640_v42 = vsub.f32 %v5394_v39, %v7118_v54  ;;  %v5656_v39 = vsub.f32 %v5404_v3, %v7121_v26  ;;  %v7123_v54 = vand.u32 4294901760, %v5542_v20  ;;  %v5672_v1 = vsub.f32 %v5434_v18, %v1047_v43  ;;  %4207 = vmatpush3.bf16.msra.mxu1 %v7074_v48 }
  0x7b   :  { %v1121_v14 = vsub.f32 %v5505_v11, %v7119_v28  ;;  %v7125_v28 = vand.u32 4294901760, %v5409_v55  ;;  %v4284_v26 = vpack.c.bf16 %v5510_v41, %v5500_v15  ;;  %v7127_v35 = vand.u32 4294901760, %v5446_v61  ;;  %4209 = vmatprep.subr.bf16.mxu1 %v7075_v29 }
  0x7c   :  { %v5663_v12 = vpack.c.bf16 %v7123_v54, %v7122_v56  ;;  %v7126_v56 = vand.u32 4294901760, %v5439_v36  ;;  %v5704_v43 = vsub.f32 %v5480_v59, %v1053_v7  ;;  %v7130_v48 = vand.u32 4294901760, %v5523_v16 }
  0x7d   :  { %v5669_v27 = vsub.f32 %v5409_v55, %v7125_v28  ;;  %v5686_v55 = vsub.f32 %v5446_v61, %v7127_v35  ;;  %v7128_v28 = vand.u32 4294901760, %v5451_v40  ;;  %v1122_v35 = vand.u32 4294901760, %v1121_v14 }
  0x7e   :  { %7124 = vst [vmem:[#allocation20_spill] sm:$0xff] %v5663_v12  ;;  %v5681_v54 = vsub.f32 %v5439_v36, %v7126_v56  ;;  %v1244_v36 = vsub.f32 %v5500_v15, %v6922_v0  ;;  %v7129_v56 = vand.u32 4294901760, %v5510_v41  ;;  %4251 = vmatpush3.bf16.msra.mxu0 %v5663_v12  ;;  %v7131_v0 = vand.u32 4294901760, %v5547_v21  ;;  %4211 = vmatpush3.bf16.msra.mxu1 %v7077_v9 }
  0x7f   :  { %v5694_v3 = vsub.f32 %v5451_v40, %v7128_v28  ;;  %v1132_v40 = vsub.f32 %v5523_v16, %v7130_v48  ;;  %v4286_v28 = vpack.c.bf16 %v5547_v21, %v5523_v16  ;;  %4285 = vmatprep.subr.bf16.mxu0 %v4284_v26  ;;  %v4288_v59 = vpack.c.bf16 %v5557_v2, %v5552_v46 }
  0x80   :  { %v1251_v61 = vsub.f32 %v5510_v41, %v7129_v56  ;;  %v1139_v18 = vsub.f32 %v5547_v21, %v7131_v0  ;;  %v7132_v7 = vand.u32 4294901760, %v5552_v46  ;;  %v7133_v48 = vand.u32 4294901760, %v5557_v2  ;;  %4213 = vmatprep.subr.bf16.mxu1 %v7078_v31 }
  0x81   :  { %v7134_v26 = vand.u32 4294901760, %v5485_v60  ;;  %v1245_v14 = vand.u32 4294901760, %v1244_v36  ;;  %1123 = vmatmul.mubr.f32.vlgmr.msra.gmra.mrb[4].mxu0 %v1122_v35  ;;  %v1133_v0 = vand.u32 4294901760, %v1132_v40  ;;  %v4290_v9 = vpack.c.bf16 %v5567_v63, %v5562_v49 }
  0x82   :  { %v1258_v56 = vsub.f32 %v5552_v46, %v7132_v7  ;;  %v1265_v12 = vsub.f32 %v5557_v2, %v7133_v48  ;;  %v1252_v44 = vand.u32 4294901760, %v1251_v61  ;;  %v7135_v48 = vand.u32 4294901760, %v5490_v17  ;;  %4287 = vmatpush3.bf16.msra.mxu0 %v4286_v28  ;;  %1490 = vmatprep.mubr.f32.mxu0 %v5285_v47 }
  0x83   :  { %v5731_v29 = vsub.f32 %v5485_v60, %v7134_v26  ;;  %v1140_v26 = vand.u32 4294901760, %v1139_v18  ;;  %v7136_v36 = vand.u32 4294901760, %v5562_v49  ;;  %v7137_v35 = vand.u32 4294901760, %v5567_v63  ;;  %4289 = vmatprep.subr.bf16.mxu0 %v4288_v59  ;;  %4215 = vmatpush3.bf16.msra.mxu1 %v7081_v25 }
  0x84   :  { %v5738_v45 = vsub.f32 %v5490_v17, %v7135_v48  ;;  %v4292_v17 = vpack.c.bf16 %v5578_v57, %v5573_v23  ;;  %v1259_v40 = vand.u32 4294901760, %v1258_v56  ;;  %v1266_v28 = vand.u32 4294901760, %v1265_v12  ;;  %4217 = vmatprep.subr.bf16.mxu1 %v7082_v33 }
  0x85   :  { %v1146_v61 = vsub.f32 %v5562_v49, %v7136_v36  ;;  %v1153_v31 = vsub.f32 %v5567_v63, %v7137_v35  ;;  %v7138_v48 = vand.u32 4294901760, %v5573_v23  ;;  %v7139_v60 = vand.u32 4294901760, %v5578_v57 }
  0x86   :  { %v7140_v35 = vand.u32 4294901760, %v5495_v8  ;;  %v7141_v7 = vand.u32 4294901760, %v5537_v38  ;;  %v4252_v12 = vpack.c.bf16 %v1252_v44, %v1245_v14  ;;  %v7142_v22 = vand.u32 4294901760, %v5584_v50  ;;  %4291 = vmatpush3.bf16.msra.mxu0 %v4290_v9 }
  0x87   :  { %v1272_v18 = vsub.f32 %v5573_v23, %v7138_v48  ;;  %v1279_v36 = vsub.f32 %v5578_v57, %v7139_v60  ;;  %v7143_v25 = vand.u32 4294901760, %v5597_v5  ;;  %v1147_v44 = vand.u32 4294901760, %v1146_v61  ;;  %4293 = vmatprep.subr.bf16.mxu0 %v4292_v17  ;;  %4219 = vmatpush3.bf16.msra.mxu1 %v7085_v51 }
  0x88   :  { %v5762_v59 = vsub.f32 %v5495_v8, %v7140_v35  ;;  %v5767_v56 = vsub.f32 %v5537_v38, %v7141_v7  ;;  %v1160_v48 = vsub.f32 %v5584_v50, %v7142_v22  ;;  %v4294_v8 = vpack.c.bf16 %v5597_v5, %v5584_v50  ;;  %4253 = vmatprep.subr.bf16.mxu1 %v4252_v12 }
  0x89   :  { %v1167_v60 = vsub.f32 %v5597_v5, %v7143_v25  ;;  %v6944_v38 = vand.u32 4294901760, %v5607_v30  ;;  %v4254_v7 = vpack.c.bf16 %v1140_v26, %v1133_v0  ;;  %v1154_v14 = vand.u32 4294901760, %v1153_v31 }
  0x8a   :  { %v4296_v22 = vpack.c.bf16 %v5607_v30, %v5602_v19  ;;  %v4256_v33 = vpack.c.bf16 %v1266_v28, %v1259_v40  ;;  %v1273_v9 = vand.u32 4294901760, %v1272_v18  ;;  %v1280_v53 = vand.u32 4294901760, %v1279_v36  ;;  %4295 = vmatpush3.bf16.msra.mxu0 %v4294_v8  ;;  %1011 = vmatmul.mubr.f32.vlgmr.msra.gmra.mrb[6].mxu1 %v4957_v6 }
  0x8b   :  { %v6941_v62 = vand.u32 4294901760, %v5619_v32  ;;  %v1161_v25 = vand.u32 4294901760, %v1160_v48  ;;  %v6940_v47 = vand.u32 4294901760, %v5624_v10  ;;  %v6936_v35 = vand.u32 4294901760, %v5629_v4  ;;  %4255 = vmatpush3.bf16.msra.mxu1 %v4254_v7  ;;  %1353 = vmatprep.mubr.f32.mxu1 %v5254_v13 }
  0x8c   :  { %v6937_v0 = vand.u32 4294901760, %v5634_v58  ;;  %v1168_v26 = vand.u32 4294901760, %v1167_v60  ;;  %v7144_v61 = vand.u32 4294901760, %v5602_v19  ;;  %v1293_v17 = vsub.f32 %v5607_v30, %v6944_v38  ;;  %4297 = vmatprep.subr.bf16.mxu0 %v4296_v22  ;;  %4257 = vmatprep.subr.bf16.mxu1 %v4256_v33 }
  0x8d   :  { %v4298_v51 = vpack.c.bf16 %v5624_v10, %v5619_v32  ;;  %v4258_v40 = vpack.c.bf16 %v1154_v14, %v1147_v44  ;;  %v6939_v28 = vand.u32 4294901760, %v5640_v42  ;;  %v6938_v18 = vand.u32 4294901760, %v5651_v52 }
  0x8e   :  { %v1286_v31 = vsub.f32 %v5602_v19, %v7144_v61  ;;  %v4300_v36 = vpack.c.bf16 %v5634_v58, %v5629_v4  ;;  %v4260_v12 = vpack.c.bf16 %v1280_v53, %v1273_v9  ;;  %v1174_v48 = vsub.f32 %v5619_v32, %v6941_v62 }
  0x8f   :  { %v6942_v60 = vand.u32 4294901760, %v5656_v39  ;;  %v6943_v8 = vand.u32 4294901760, %v5669_v27  ;;  %v1181_v44 = vsub.f32 %v5624_v10, %v6940_v47  ;;  %v1300_v14 = vsub.f32 %v5629_v4, %v6936_v35  ;;  %4299 = vmatpush3.bf16.msra.mxu0 %v4298_v51  ;;  %4259 = vmatpush3.bf16.msra.mxu1 %v4258_v40 }
  0x90   :  { %v1307_v6 = vsub.f32 %v5634_v58, %v6937_v0  ;;  %v4262_v53 = vpack.c.bf16 %v1168_v26, %v1161_v25  ;;  %v1287_v22 = vand.u32 4294901760, %v1286_v31  ;;  %v1294_v9 = vand.u32 4294901760, %v1293_v17  ;;  %4301 = vmatprep.subr.bf16.mxu0 %v4300_v36  ;;  %4261 = vmatprep.subr.bf16.mxu1 %v4260_v12 }
  0x91   :  { %v4302_v7 = vpack.c.bf16 %v5651_v52, %v5640_v42  ;;  %v1188_v61 = vsub.f32 %v5640_v42, %v6939_v28  ;;  %v1195_v35 = vsub.f32 %v5651_v52, %v6938_v18  ;;  %v1201_v0 = vand.u32 4294901760, %v5672_v1 }
  0x92   :  { %v4304_v33 = vpack.c.bf16 %v5669_v27, %v5656_v39  ;;  %v1314_v25 = vsub.f32 %v5656_v39, %v6942_v60  ;;  %v1321_v26 = vsub.f32 %v5669_v27, %v6943_v8  ;;  %v1175_v51 = vand.u32 4294901760, %v1174_v48 }
  0x93   :  { %v1182_v36 = vand.u32 4294901760, %v1181_v44  ;;  %v1301_v18 = vand.u32 4294901760, %v1300_v14  ;;  %v1308_v28 = vand.u32 4294901760, %v1307_v6  ;;  %v7145_v47 = vand.u32 4294901760, %v5542_v20  ;;  %4303 = vmatpush3.bf16.msra.mxu0 %v4302_v7  ;;  %4263 = vmatpush3.bf16.msra.mxu1 %v4262_v53 }
  0x94   :  { %v4264_v60 = vpack.c.bf16 %v1294_v9, %v1287_v22  ;;  %v4306_v8 = vpack.c.bf16 %v5681_v54, %v5672_v1  ;;  %v1334_v38 = vand.u32 4294901760, %v5694_v3  ;;  %v1189_v31 = vand.u32 4294901760, %v1188_v61  ;;  %4305 = vmatprep.subr.bf16.mxu0 %v4304_v33 }
  0x95   :  { %v5837_v62 = vsub.f32 %v5542_v20, %v7145_v47  ;;  %v1196_v17 = vand.u32 4294901760, %v1195_v35  ;;  %v1202_v40 = vsub.f32 %v5672_v1, %v1201_v0  ;;  %v4308_v48 = vpack.c.bf16 %v5694_v3, %v5686_v55  ;;  %v5968_v1 = vld [vmem:[%s6824_s1 + $0x288] sm:$0xff] }
  0x96   :  { %v1315_v47 = vand.u32 4294901760, %v1314_v25  ;;  %v1322_v20 = vand.u32 4294901760, %v1321_v26  ;;  %v7146_v12 = vand.u32 4294901760, %v5681_v54  ;;  %v7147_v14 = vand.u32 4294901760, %v5686_v55  ;;  %4265 = vmatprep.subr.bf16.mxu1 %v4264_v60 }
  0x97   :  { %v4266_v35 = vpack.c.bf16 %v1182_v36, %v1175_v51  ;;  %v4268_v22 = vpack.c.bf16 %v1308_v28, %v1301_v18  ;;  %v1215_v9 = vand.u32 4294901760, %v5704_v43  ;;  %v6947_v7 = vand.u32 4294901760, %v5731_v29  ;;  %4307 = vmatpush3.bf16.msra.mxu0 %v4306_v8 }
  0x98   :  { %v1209_v44 = vsub.f32 %v5681_v54, %v7146_v12  ;;  %v1328_v6 = vsub.f32 %v5686_v55, %v7147_v14  ;;  %v1335_v61 = vsub.f32 %v5694_v3, %v1334_v38  ;;  %v4310_v33 = vpack.c.bf16 %v5731_v29, %v5704_v43  ;;  %4309 = vmatprep.subr.bf16.mxu0 %v4308_v48 }
  0x99   :  { %v6946_v25 = vand.u32 4294901760, %v5738_v45  ;;  %v6945_v26 = vand.u32 4294901760, %v5762_v59  ;;  %v4270_v53 = vpack.c.bf16 %v1196_v17, %v1189_v31  ;;  %v4312_v28 = vpack.c.bf16 %v5762_v59, %v5738_v45  ;;  %4267 = vmatpush3.bf16.msra.mxu1 %v4266_v35 }
  0x9a   :  { %v4272_v18 = vpack.c.bf16 %v1322_v20, %v1315_v47  ;;  %v1203_v51 = vand.u32 4294901760, %v1202_v40  ;;  %v1210_v60 = vand.u32 4294901760, %v1209_v44  ;;  %v1329_v8 = vand.u32 4294901760, %v1328_v6  ;;  %4269 = vmatprep.subr.bf16.mxu1 %v4268_v22 }
  0x9b   :  { %v1216_v36 = vsub.f32 %v5704_v43, %v1215_v9  ;;  %v1223_v12 = vsub.f32 %v5731_v29, %v6947_v7  ;;  %v1229_v14 = vand.u32 4294901760, %v5767_v56  ;;  %v1236_v31 = vand.u32 4294901760, %v5837_v62  ;;  %4311 = vmatpush3.bf16.msra.mxu0 %v4310_v33  ;;  %v5990_v43 = vld [vmem:[%s6824_s1 + $0x208] sm:$0xff] }
  0x9c   :  { %v1336_v17 = vand.u32 4294901760, %v1335_v61  ;;  %v1342_v40 = vsub.f32 %v5738_v45, %v6946_v25  ;;  %v1349_v48 = vsub.f32 %v5762_v59, %v6945_v26  ;;  %v4314_v47 = vpack.c.bf16 %v5837_v62, %v5767_v56  ;;  %4313 = vmatprep.subr.bf16.mxu0 %v4312_v28 }
  0x9d   :  { %v7148_v20 = vand.u32 4294901760, %v5500_v15  ;;  %v7149_v44 = vand.u32 4294901760, %v5510_v41  ;;  %v4274_v35 = vpack.c.bf16 %v1210_v60, %v1203_v51  ;;  %4271 = vmatpush3.bf16.msra.mxu1 %v4270_v53  ;;  %v1217_v22 = vand.u32 4294901760, %v1216_v36 }
  0x9e   :  { %v1224_v61 = vand.u32 4294901760, %v1223_v12  ;;  %v1230_v33 = vsub.f32 %v5767_v56, %v1229_v14  ;;  %v1237_v26 = vsub.f32 %v5837_v62, %v1236_v31  ;;  %4273 = vmatprep.subr.bf16.mxu1 %v4272_v18  ;;  %v4276_v25 = vpack.c.bf16 %v1336_v17, %v1329_v8  ;;  %v6022_v62 = vld [vmem:[%s6824_s1 + $0x210] sm:$0xff]  ;;  %v6027_v56 = vld [vmem:[%s6824_s1 + $0x218] sm:$0xff] }
  0x9f   :  { %v4348_v6 = vpack.c.bf16 %v7149_v44, %v7148_v20  ;;  %v1343_v28 = vand.u32 4294901760, %v1342_v40  ;;  %v1350_v7 = vand.u32 4294901760, %v1349_v48  ;;  %4315 = vmatpush3.bf16.msra.mxu0 %v4314_v47  ;;  %v7150_v41 = vand.u32 4294901760, %v5523_v16 }
  0xa0   :  { %v7151_v15 = vand.u32 4294901760, %v5547_v21  ;;  %v7152_v51 = vand.u32 4294901760, %v5552_v46  ;;  %v7153_v60 = vand.u32 4294901760, %v5557_v2  ;;  %v4278_v12 = vpack.c.bf16 %v1224_v61, %v1217_v22 }
  0xa1   :  { %4349 = vmatprep.subr.bf16.mxu0 %v4348_v6  ;;  %4275 = vmatpush3.bf16.msra.mxu1 %v4274_v35  ;;  %v1231_v20 = vand.u32 4294901760, %v1230_v33  ;;  %v1238_v44 = vand.u32 4294901760, %v1237_v26  ;;  %v4280_v18 = vpack.c.bf16 %v1350_v7, %v1343_v28  ;;  %v7154_v16 = vand.u32 4294901760, %v5562_v49  ;;  %v7166_v35 = vld [vmem:[#allocation5_spill] sm:$0xff] }
  0xa2   :  { %v4350_v53 = vpack.c.bf16 %v7151_v15, %v7150_v41  ;;  %v4352_v36 = vpack.c.bf16 %v7153_v60, %v7152_v51  ;;  %1493 = vmatmul.mubr.f32.vlgmr.msra.gmra.mrb[6].mxu0 %v5505_v11  ;;  %4277 = vmatprep.subr.bf16.mxu1 %v4276_v25  ;;  %v7155_v21 = vand.u32 4294901760, %v5567_v63  ;;  %v7156_v46 = vand.u32 4294901760, %v5573_v23  ;;  %v7173_v15 = vld [vmem:[#allocation6_spill] sm:$0xff]  ;;  %v5963_v60 = vld [vmem:[%s6824_s1 + $0x280] sm:$0xff] }
  0xa3   :  { %v7157_v2 = vand.u32 4294901760, %v5578_v57  ;;  %1767 = vmatprep.mubr.f32.mxu0 %v5254_v13  ;;  %v4282_v26 = vpack.c.bf16 %v1238_v44, %v1231_v20  ;;  %v7158_v7 = vand.u32 4294901760, %v5584_v50  ;;  %v7159_v25 = vand.u32 4294901760, %v5597_v5 }
  0xa4   :  { %4351 = vmatpush3.bf16.msra.mxu0 %v4350_v53  ;;  %v4354_v8 = vpack.c.bf16 %v7155_v21, %v7154_v16  ;;  %v7160_v63 = vand.u32 4294901760, %v5602_v19  ;;  %v7161_v40 = vand.u32 4294901760, %v5607_v30  ;;  %v5919_v57 = vld.sshfl [vmem:[%s6823_s0 + $0x8] sm:$0x33 pattern:$0x76325410]  ;;  %v4378_v21 = vpack.c.bf16 %v1236_v31, %v1229_v14 }
  0xa5   :  { %4353 = vmatprep.subr.bf16.mxu0 %v4352_v36  ;;  %v4356_v17 = vpack.c.bf16 %v7157_v2, %v7156_v46  ;;  %4279 = vmatpush3.bf16.msra.mxu1 %v4278_v12  ;;  %v4358_v49 = vpack.c.bf16 %v7159_v25, %v7158_v7  ;;  %v7162_v50 = vand.u32 4294901760, %v5619_v32  ;;  %v7163_v5 = vand.u32 4294901760, %v5624_v10  ;;  %v7168_v32 = vld [vmem:[#allocation16_spill] sm:$0xff]  ;;  %v7174_v53 = vld [vmem:[#allocation7_spill] sm:$0xff]  ;;  %v7184_v16 = vld [vmem:[#allocation10_spill] sm:$0xff] }
  0xa6   :  { %4281 = vmatprep.subr.bf16.mxu1 %v4280_v18  ;;  %v4360_v23 = vpack.c.bf16 %v7161_v40, %v7160_v63  ;;  %v7164_v19 = vand.u32 4294901760, %v5629_v4  ;;  %v7165_v30 = vand.u32 4294901760, %v5634_v58  ;;  %v147_v6 = vcombine.high %v5919_v57, %v5919_v57  ;;  %v5985_v18 = vld [vmem:[%s6824_s1 + $0x200] sm:$0xff]  ;;  %v6040_v7 = vld [vmem:[%s6824_s1 + $0x2a8] sm:$0xff]  ;;  %v7185_v25 = vld [vmem:[#allocation11_spill] sm:$0xff] }
  0xa7   :  { %v4362_v48 = vpack.c.bf16 %v7163_v5, %v7162_v50  ;;  %v7167_v22 = vand.u32 4294901760, %v7166_v35  ;;  %v7169_v10 = vand.u32 4294901760, %v5640_v42  ;;  %v7170_v4 = vand.u32 4294901760, %v5651_v52  ;;  %v6035_v31 = vld [vmem:[%s6824_s1 + $0x2a0] sm:$0xff]  ;;  %v6079_v35 = vld [vmem:[%s6824_s1 + $0x2b8] sm:$0xff] }
  0xa8   :  { %4355 = vmatpush3.bf16.msra.mxu0 %v4354_v8  ;;  %v4364_v47 = vpack.c.bf16 %v7165_v30, %v7164_v19  ;;  %v7171_v58 = vand.u32 4294901760, %v5656_v39  ;;  %v7172_v33 = vand.u32 4294901760, %v5669_v27  ;;  %v5945_v41 = vand.u32 4294901760, %v147_v6  ;;  %v6064_v19 = vld [vmem:[%s6824_s1 + $0x220] sm:$0xff]  ;;  %v6069_v30 = vld [vmem:[%s6824_s1 + $0x228] sm:$0xff] }
  0xa9   :  { %4357 = vmatprep.subr.bf16.mxu0 %v4356_v17  ;;  %4283 = vmatpush3.bf16.msra.mxu1 %v4282_v26  ;;  %v4366_v61 = vpack.c.bf16 %v7170_v4, %v7169_v10  ;;  %v7175_v42 = vand.u32 4294901760, %v5681_v54  ;;  %v7176_v52 = vand.u32 4294901760, %v5686_v55  ;;  %v7178_v54 = vld [vmem:[#allocation8_spill] sm:$0xff]  ;;  %v7180_v3 = vand.u32 4294901760, %v5731_v29  ;;  %v7189_v10 = vld [vmem:[#allocation15_spill] sm:$0xff] }
  0xaa   :  { %4317 = vmatprep.subr.bf16.mxu1 %v5260_v24  ;;  %v4368_v28 = vpack.c.bf16 %v7172_v33, %v7171_v58  ;;  %v5958_v27 = vsub.f32 %v147_v6, %v5945_v41  ;;  %v7182_v36 = vand.u32 4294901760, %v5762_v59  ;;  %v1927_v20 = vand.u32 4294901760, %v5963_v60  ;;  %v6001_v59 = vld [vmem:[%s6824_s1 + $0x298] sm:$0xff]  ;;  %v6074_v6 = vld [vmem:[%s6824_s1 + $0x2b0] sm:$0xff] }
  0xab   :  { %v4370_v51 = vpack.c.bf16 %v7175_v42, %v1201_v0  ;;  %v4372_v39 = vpack.c.bf16 %v1334_v38, %v7176_v52  ;;  %v7179_v0 = vld [vmem:[#allocation18_spill] sm:$0xff]  ;;  %v4374_v55 = vpack.c.bf16 %v7180_v3, %v1215_v9  ;;  %v7181_v38 = vand.u32 4294901760, %v5738_v45  ;;  %v7183_v9 = vld [vmem:[#allocation9_spill] sm:$0xff]  ;;  %v6110_v52 = vld [vmem:[%s6824_s1 + $0x238] sm:$0xff] }
  0xac   :  { %4359 = vmatpush3.bf16.msra.mxu0 %v4358_v49  ;;  %1355 = vmatmul.mubr.f32.vlgmr.msra.gmra.mrb[8].mxu1 %v5456_v37  ;;  %7177 = vst [vmem:[#allocation5_spill] sm:$0xff] %v5958_v27  ;;  %v6965_v44 = vand.u32 4294901760, %v5968_v1  ;;  %v6948_v29 = vand.u32 4294901760, %v5958_v27  ;;  %v5996_v45 = vld [vmem:[%s6824_s1 + $0x290] sm:$0xff]  ;;  %v6964_v8 = vand.u32 4294901760, %v5985_v18  ;;  %v6961_v46 = vand.u32 4294901760, %v5990_v43 }
  0xad   :  { %4361 = vmatprep.subr.bf16.mxu0 %v4360_v23  ;;  %4319 = vmatpush3.bf16.msra.mxu1 %v5293_v34  ;;  %v4376_v12 = vpack.c.bf16 %v7182_v36, %v7181_v38  ;;  %v6958_v17 = vand.u32 4294901760, %v5996_v45  ;;  %v6957_v26 = vand.u32 4294901760, %v6001_v59  ;;  %v7186_v49 = vld [vmem:[#allocation12_spill] sm:$0xff]  ;;  %v6956_v40 = vand.u32 4294901760, %v6022_v62  ;;  %v6120_v3 = vld [vmem:[%s6824_s1 + $0x2c8] sm:$0xff]  ;;  %v7193_v38 = vld [vmem:[#allocation19_spill] sm:$0xff] }
  0xae   :  { %1597 = vmatprep.mubr.f32.mxu1 %v7167_v22  ;;  %4321 = vmatprep.subr.bf16.mxu1 %v7168_v32  ;;  %v6015_v2 = vpack.c.bf16 %v6965_v44, %v1927_v20  ;;  %v1977_v14 = vsub.f32 %v5958_v27, %v6948_v29  ;;  %v6048_v63 = vpack.c.bf16 %v6961_v46, %v6964_v8  ;;  %v6955_v23 = vand.u32 4294901760, %v6027_v56  ;;  %v7188_v22 = vld [vmem:[#allocation13_spill] sm:$0xff]  ;;  %v6241_v44 = vld [vmem:[%s6824_s1 + $0x2f0] sm:$0xff] }
  0xaf   :  { %v6057_v50 = vpack.c.bf16 %v6957_v26, %v6958_v17  ;;  %v6954_v5 = vand.u32 4294901760, %v6035_v31  ;;  %v6949_v58 = vand.u32 4294901760, %v6069_v30  ;;  %v6952_v42 = vand.u32 4294901760, %v6079_v35 }
  0xb0   :  { %4363 = vmatpush3.bf16.msra.mxu0 %v4362_v48  ;;  %v6951_v48 = vand.u32 4294901760, %v6040_v7  ;;  %v6089_v4 = vpack.c.bf16 %v6955_v23, %v6956_v40  ;;  %v6962_v29 = vand.u32 4294901760, %v6120_v3  ;;  %v7199_v46 = vand.u32 4294901760, %v5505_v11 }
  0xb1   :  { %4365 = vmatprep.subr.bf16.mxu0 %v4364_v47  ;;  %4323 = vmatpush3.bf16.msra.mxu1 %v7173_v15  ;;  %7187 = vst [vmem:[#allocation16_spill] sm:$0xff] %v6057_v50  ;;  %v1978_v47 = vand.u32 4294901760, %v1977_v14  ;;  %v6207_v8 = vand.u32 4294901760, %v5919_v57 }
  0xb2   :  { %4325 = vmatprep.subr.bf16.mxu1 %v7174_v53  ;;  %7190 = vst [vmem:[#allocation6_spill] sm:$0xff] %v6089_v4  ;;  %v6098_v33 = vpack.c.bf16 %v6951_v48, %v6954_v5  ;;  %v6155_v48 = vld [vmem:[%s6824_s1 + $0x2d0] sm:$0xff] }
  0xb4   :  { %4367 = vmatpush3.bf16.msra.mxu0 %v4366_v61  ;;  %v6950_v61 = vand.u32 4294901760, %v6064_v19  ;;  %7191 = vst [vmem:[#allocation7_spill] sm:$0xff] %v6098_v33 }
  0xb5   :  { %4369 = vmatprep.subr.bf16.mxu0 %v4368_v28  ;;  %4327 = vmatpush3.bf16.msra.mxu1 %v7178_v54  ;;  %v6953_v28 = vand.u32 4294901760, %v6074_v6 }
  0xb6   :  { %4329 = vmatprep.subr.bf16.mxu1 %v7179_v0  ;;  %v6129_v36 = vpack.c.bf16 %v6949_v58, %v6950_v61  ;;  %v6145_v58 = vld [vmem:[%s6824_s1 + $0x240] sm:$0xff]  ;;  %v6150_v61 = vld [vmem:[%s6824_s1 + $0x248] sm:$0xff] }
  0xb7   :  { %v6138_v14 = vpack.c.bf16 %v6952_v42, %v6953_v28  ;;  %v6160_v42 = vld [vmem:[%s6824_s1 + $0x2d8] sm:$0xff]  ;;  %v6967_v23 = vand.u32 4294901760, %v6145_v58  ;;  %v6966_v40 = vand.u32 4294901760, %v6150_v61 }
  0xb8   :  { %4371 = vmatpush3.bf16.msra.mxu0 %v4370_v51  ;;  %v6105_v51 = vld [vmem:[%s6824_s1 + $0x230] sm:$0xff]  ;;  %7194 = vst [vmem:[#allocation8_spill] sm:$0xff] %v6129_v36  ;;  %v7196_v28 = vld [vmem:[#allocation20_spill] sm:$0xff]  ;;  %v6968_v17 = vand.u32 4294901760, %v6160_v42 }
  0xb9   :  { %4373 = vmatprep.subr.bf16.mxu0 %v4372_v39  ;;  %4331 = vmatpush3.bf16.msra.mxu1 %v7183_v9  ;;  %v6115_v39 = vld [vmem:[%s6824_s1 + $0x2c0] sm:$0xff]  ;;  %7195 = vst [vmem:[#allocation18_spill] sm:$0xff] %v6138_v14  ;;  %v6215_v11 = vpack.c.bf16 %v6966_v40, %v6967_v23  ;;  %v6236_v23 = vld [vmem:[%s6824_s1 + $0x268] sm:$0xff] }
  0xba   :  { %4333 = vmatprep.subr.bf16.mxu1 %v7184_v16  ;;  %v6231_v40 = vld [vmem:[%s6824_s1 + $0x260] sm:$0xff] }
  0xbb   :  { %7200 = vst [vmem:[#allocation11_spill] sm:$0xff] %v6215_v11 }
  0xbc   :  { %4375 = vmatpush3.bf16.msra.mxu0 %v4374_v55  ;;  %v7192_v55 = vld [vmem:[#allocation17_spill] sm:$0xff] }
  0xbd   :  { %4377 = vmatprep.subr.bf16.mxu0 %v4376_v12  ;;  %4335 = vmatpush3.bf16.msra.mxu1 %v7185_v25  ;;  %v6960_v12 = vand.u32 4294901760, %v6105_v51 }
  0xbe   :  { %4337 = vmatprep.subr.bf16.mxu1 %v7186_v49 }
  0xc0   :  { %4379 = vmatpush3.bf16.msra.mxu0 %v4378_v21  ;;  %v6959_v21 = vand.u32 4294901760, %v6110_v52 }
  0xc1   :  { %4413 = vmatprep.subr.bf16.mxu0 %v6015_v2  ;;  %4339 = vmatpush3.bf16.msra.mxu1 %v7188_v22 }
  0xc2   :  { %4341 = vmatprep.subr.bf16.mxu1 %v7189_v10  ;;  %v6169_v5 = vpack.c.bf16 %v6959_v21, %v6960_v12  ;;  %v6185_v21 = vld [vmem:[%s6824_s1 + $0x250] sm:$0xff]  ;;  %v6190_v12 = vld [vmem:[%s6824_s1 + $0x258] sm:$0xff] }
  0xc3   :  { %1769 = vmatmul.mubr.f32.vlgmr.msra.gmra.mrb[8].mxu0 %v5456_v37 }
  0xc4   :  { %4415 = vmatpush3.bf16.msra.mxu0 %v6048_v63  ;;  %1979 = vmatprep.mubr.f32.mxu0 %v1978_v47  ;;  %v6963_v47 = vand.u32 4294901760, %v6115_v39  ;;  %7197 = vst [vmem:[#allocation9_spill] sm:$0xff] %v6169_v5 }
  0xc5   :  { %4417 = vmatprep.subr.bf16.mxu0 %v6057_v50  ;;  %4343 = vmatpush3.bf16.msra.mxu1 %v7192_v55 }
  0xc6   :  { %4345 = vmatprep.subr.bf16.mxu1 %v7193_v38  ;;  %v6178_v26 = vpack.c.bf16 %v6962_v29, %v6963_v47  ;;  %v6197_v29 = vld [vmem:[%s6824_s1 + $0x2e0] sm:$0xff]  ;;  %v6202_v47 = vld [vmem:[%s6824_s1 + $0x2e8] sm:$0xff] }
  0xc8   :  { %4419 = vmatpush3.bf16.msra.mxu0 %v6089_v4  ;;  %7198 = vst [vmem:[#allocation10_spill] sm:$0xff] %v6178_v26  ;;  %v7213_v4 = vand.u32 4294901760, %v6027_v56 }
  0xc9   :  { %4421 = vmatprep.subr.bf16.mxu0 %v6098_v33  ;;  %4347 = vmatpush3.bf16.msra.mxu1 %v7196_v28 }
  0xca   :  { %4381 = vmatprep.subr.bf16.mxu1 %v5260_v24  ;;  %v6969_v24 = vand.u32 4294901760, %v6155_v48 }
  0xcc   :  { %4423 = vmatpush3.bf16.msra.mxu0 %v6129_v36  ;;  %1601 = vmatmul.mubr.f32.vlgmr.msra.gmra.mrb[10].mxu1 %v7199_v46  ;;  %v1909_v46 = vand.u32 4294901760, %v6185_v21  ;;  %v7212_v36 = vand.u32 4294901760, %v6022_v62 }
  0xcd   :  { %4425 = vmatprep.subr.bf16.mxu0 %v6138_v14  ;;  %4383 = vmatpush3.bf16.msra.mxu1 %v5293_v34  ;;  %v7202_v34 = vand.u32 4294901760, %v5968_v1 }
  0xce   :  { %1871 = vmatprep.mubr.f32.mxu1 %v5254_v13  ;;  %4385 = vmatprep.subr.bf16.mxu1 %v7168_v32  ;;  %v6224_v13 = vpack.c.bf16 %v6968_v17, %v6969_v24  ;;  %v6246_v17 = vld [vmem:[%s6824_s1 + $0x2f8] sm:$0xff]  ;;  %v6251_v24 = vsub.f32 %v5963_v60, %v1927_v20  ;;  %v6256_v32 = vsub.f32 %v5919_v57, %v6207_v8  ;;  %v1915_v60 = vand.u32 4294901760, %v6231_v40 }
  0xcf   :  { %v7205_v57 = vand.u32 4294901760, %v5985_v18  ;;  %v6313_v33 = vsub.f32 %v6022_v62, %v7212_v36  ;;  %v7216_v36 = vand.u32 4294901760, %v6064_v19  ;;  %v7228_v62 = vand.u32 4294901760, %v6120_v3 }
  0xd0   :  { %4427 = vmatpush3.bf16.msra.mxu0 %v6169_v5  ;;  %7201 = vst [vmem:[#allocation12_spill] sm:$0xff] %v6224_v13  ;;  %v7203_v5 = vand.u32 4294901760, %v6190_v12 }
  0xd1   :  { %4429 = vmatprep.subr.bf16.mxu0 %v6178_v26  ;;  %4387 = vmatpush3.bf16.msra.mxu1 %v7173_v15  ;;  %v6261_v26 = vsub.f32 %v5968_v1, %v7202_v34  ;;  %v6274_v20 = vsub.f32 %v5985_v18, %v7205_v57  ;;  %v7206_v1 = vand.u32 4294901760, %v6197_v29  ;;  %v6288_v15 = vld [vmem:[%s6824_s1 + $0x270] sm:$0xff]  ;;  %v6293_v18 = vld [vmem:[%s6824_s1 + $0x278] sm:$0xff]  ;;  %v7209_v57 = vand.u32 4294901760, %v5990_v43 }
  0xd2   :  { %4389 = vmatprep.subr.bf16.mxu1 %v7174_v53  ;;  %v6267_v14 = vpack.c.bf16 %v7203_v5, %v1909_v46  ;;  %v7207_v53 = vand.u32 4294901760, %v6202_v47 }
  0xd4   :  { %4431 = vmatpush3.bf16.msra.mxu0 %v6215_v11  ;;  %7204 = vst [vmem:[#allocation13_spill] sm:$0xff] %v6267_v14  ;;  %v6281_v34 = vpack.c.bf16 %v7207_v53, %v7206_v1  ;;  %v7210_v1 = vand.u32 4294901760, %v5996_v45  ;;  %v7211_v11 = vand.u32 4294901760, %v6001_v59 }
  0xd5   :  { %4433 = vmatprep.subr.bf16.mxu0 %v6224_v13  ;;  %v6298_v13 = vsub.f32 %v5990_v43, %v7209_v57  ;;  %v6318_v43 = vsub.f32 %v6027_v56, %v7213_v4  ;;  %4391 = vmatpush3.bf16.msra.mxu1 %v7178_v54  ;;  %v7217_v54 = vand.u32 4294901760, %v6236_v23  ;;  %v7219_v4 = vand.u32 4294901760, %v6069_v30 }
  0xd6   :  { %7208 = vst [vmem:[#allocation15_spill] sm:$0xff] %v6281_v34  ;;  %v6303_v53 = vsub.f32 %v5996_v45, %v7210_v1  ;;  %v6308_v5 = vsub.f32 %v6001_v59, %v7211_v11  ;;  %v7214_v45 = vand.u32 4294901760, %v6035_v31  ;;  %v7215_v59 = vand.u32 4294901760, %v6040_v7  ;;  %4393 = vmatprep.subr.bf16.mxu1 %v7179_v0 }
  0xd7   :  { %v6335_v1 = vsub.f32 %v6064_v19, %v7216_v36  ;;  %v6341_v56 = vpack.c.bf16 %v7217_v54, %v1915_v60  ;;  %v7220_v19 = vand.u32 4294901760, %v6074_v6  ;;  %v7221_v0 = vand.u32 4294901760, %v6079_v35 }
  0xd8   :  { %v6324_v57 = vsub.f32 %v6035_v31, %v7214_v45  ;;  %v6329_v11 = vsub.f32 %v6040_v7, %v7215_v59  ;;  %4435 = vmatpush3.bf16.msra.mxu0 %v6267_v14  ;;  %v6348_v45 = vsub.f32 %v6069_v30, %v7219_v4  ;;  %v7222_v54 = vand.u32 4294901760, %v6241_v44 }
  0xd9   :  { %7218 = vst [vmem:[#allocation17_spill] sm:$0xff] %v6341_v56  ;;  %v6353_v59 = vsub.f32 %v6074_v6, %v7220_v19  ;;  %v6358_v36 = vsub.f32 %v6079_v35, %v7221_v0  ;;  %4437 = vmatprep.subr.bf16.mxu0 %v6281_v34  ;;  %v7223_v7 = vand.u32 4294901760, %v6246_v17  ;;  %v7225_v30 = vand.u32 4294901760, %v6105_v51  ;;  %4395 = vmatpush3.bf16.msra.mxu1 %v7183_v9 }
  0xda   :  { %v7226_v6 = vand.u32 4294901760, %v6110_v52  ;;  %v7227_v35 = vand.u32 4294901760, %v6115_v39  ;;  %4397 = vmatprep.subr.bf16.mxu1 %v7184_v16  ;;  %v7232_v9 = vand.u32 4294901760, %v6155_v48  ;;  %v7238_v16 = vand.u32 4294901760, %v6197_v29 }
  0xdb   :  { %v6365_v31 = vpack.c.bf16 %v7223_v7, %v7222_v54  ;;  %v6370_v4 = vsub.f32 %v6105_v51, %v7225_v30  ;;  %v6385_v7 = vsub.f32 %v6120_v3, %v7228_v62  ;;  %v7229_v51 = vand.u32 4294901760, %v6145_v58 }
  0xdc   :  { %v6375_v19 = vsub.f32 %v6110_v52, %v7226_v6  ;;  %v6380_v0 = vsub.f32 %v6115_v39, %v7227_v35  ;;  %v6986_v52 = vand.u32 4294901760, %v6251_v24  ;;  %v7230_v6 = vand.u32 4294901760, %v6256_v32  ;;  %4439 = vmatpush3.bf16.msra.mxu0 %v6341_v56 }
  0xdd   :  { %7224 = vst [vmem:[#allocation19_spill] sm:$0xff] %v6365_v31  ;;  %v6391_v54 = vsub.f32 %v6145_v58, %v7229_v51  ;;  %v7231_v3 = vand.u32 4294901760, %v6150_v61  ;;  %v6407_v58 = vsub.f32 %v6155_v48, %v7232_v9  ;;  %v7233_v35 = vand.u32 4294901760, %v6288_v15  ;;  %4441 = vmatprep.subr.bf16.mxu0 %v6365_v31  ;;  %4399 = vmatpush3.bf16.msra.mxu1 %v7185_v25 }
  0xde   :  { %v1983_v39 = vsub.f32 %v6256_v32, %v7230_v6  ;;  %v7234_v51 = vand.u32 4294901760, %v6293_v18  ;;  %v7236_v6 = vand.u32 4294901760, %v6160_v42  ;;  %v4476_v9 = vpack.c.bf16 %v6261_v26, %v6251_v24  ;;  %4401 = vmatprep.subr.bf16.mxu1 %v7186_v49 }
  0xdf   :  { %v6402_v62 = vsub.f32 %v6150_v61, %v7231_v3  ;;  %v6423_v3 = vsub.f32 %v6185_v21, %v1909_v46  ;;  %v6455_v46 = vsub.f32 %v6231_v40, %v1915_v60  ;;  %v7241_v25 = vand.u32 4294901760, %v6274_v20 }
  0xe0   :  { %v6414_v30 = vpack.c.bf16 %v7234_v51, %v7233_v35  ;;  %v6420_v61 = vsub.f32 %v6160_v42, %v7236_v6  ;;  %v7237_v35 = vand.u32 4294901760, %v6190_v12  ;;  %v6437_v42 = vsub.f32 %v6197_v29, %v7238_v16 }
  0xe1   :  { %v7239_v6 = vand.u32 4294901760, %v6202_v47  ;;  %v1984_v16 = vand.u32 4294901760, %v1983_v39  ;;  %v4480_v40 = vpack.c.bf16 %v6308_v5, %v6303_v53  ;;  %v7243_v60 = vand.u32 4294901760, %v6303_v53  ;;  %4403 = vmatpush3.bf16.msra.mxu1 %v7188_v22 }
  0xe2   :  { %7235 = vst [vmem:[#allocation20_spill] sm:$0xff] %v6414_v30  ;;  %v6432_v51 = vsub.f32 %v6190_v12, %v7237_v35  ;;  %v2106_v12 = vsub.f32 %v6251_v24, %v6986_v52  ;;  %v7240_v35 = vand.u32 4294901760, %v6261_v26  ;;  %4443 = vmatpush3.bf16.msra.mxu0 %v6414_v30  ;;  %v7242_v52 = vand.u32 4294901760, %v6298_v13  ;;  %4405 = vmatprep.subr.bf16.mxu1 %v7189_v10 }
  0xe3   :  { %v6445_v48 = vsub.f32 %v6202_v47, %v7239_v6  ;;  %v1994_v47 = vsub.f32 %v6274_v20, %v7241_v25  ;;  %v4478_v6 = vpack.c.bf16 %v6298_v13, %v6274_v20  ;;  %4477 = vmatprep.subr.bf16.mxu0 %v4476_v9  ;;  %v7244_v25 = vand.u32 4294901760, %v6308_v5 }
  0xe4   :  { %v2113_v29 = vsub.f32 %v6261_v26, %v7240_v35  ;;  %v2001_v21 = vsub.f32 %v6298_v13, %v7242_v52  ;;  %v2120_v35 = vsub.f32 %v6303_v53, %v7243_v60  ;;  %v7245_v9 = vand.u32 4294901760, %v6236_v23 }
  0xe5   :  { %v2127_v30 = vsub.f32 %v6308_v5, %v7244_v25  ;;  %v2107_v39 = vand.u32 4294901760, %v2106_v12  ;;  %1985 = vmatmul.mubr.f32.vlgmr.msra.gmra.mrb[10].mxu0 %v1984_v16  ;;  %v7246_v25 = vand.u32 4294901760, %v6241_v44  ;;  %v1995_v52 = vand.u32 4294901760, %v1994_v47  ;;  %4407 = vmatpush3.bf16.msra.mxu1 %v7192_v55 }
  0xe6   :  { %v6482_v49 = vsub.f32 %v6236_v23, %v7245_v9  ;;  %v2114_v56 = vand.u32 4294901760, %v2113_v29  ;;  %4479 = vmatpush3.bf16.msra.mxu0 %v4478_v6  ;;  %v4482_v22 = vpack.c.bf16 %v6318_v43, %v6313_v33  ;;  %v2002_v9 = vand.u32 4294901760, %v2001_v21  ;;  %2352 = vmatprep.mubr.f32.mxu0 %v5958_v27 }
  0xe7   :  { %v6489_v31 = vsub.f32 %v6241_v44, %v7246_v25  ;;  %v7247_v12 = vand.u32 4294901760, %v6313_v33  ;;  %v7248_v16 = vand.u32 4294901760, %v6318_v43  ;;  %4481 = vmatprep.subr.bf16.mxu0 %v4480_v40  ;;  %v4484_v44 = vpack.c.bf16 %v6329_v11, %v6324_v57  ;;  %4409 = vmatprep.subr.bf16.mxu1 %v7193_v38 }
  0xe8   :  { %v2121_v47 = vand.u32 4294901760, %v2120_v35  ;;  %v2128_v6 = vand.u32 4294901760, %v2127_v30  ;;  %v7249_v25 = vand.u32 4294901760, %v6324_v57  ;;  %v7250_v23 = vand.u32 4294901760, %v6329_v11 }
  0xe9   :  { %v2008_v29 = vsub.f32 %v6313_v33, %v7247_v12  ;;  %v2015_v10 = vsub.f32 %v6318_v43, %v7248_v16  ;;  %v7251_v16 = vand.u32 4294901760, %v6246_v17  ;;  %v7252_v60 = vand.u32 4294901760, %v6288_v15  ;;  %4411 = vmatpush3.bf16.msra.mxu1 %v7196_v28 }
  0xea   :  { %v2134_v21 = vsub.f32 %v6324_v57, %v7249_v25  ;;  %v2141_v12 = vsub.f32 %v6329_v11, %v7250_v23  ;;  %v4444_v30 = vpack.c.bf16 %v2114_v56, %v2107_v39  ;;  %v7253_v34 = vand.u32 4294901760, %v6335_v1  ;;  %4483 = vmatpush3.bf16.msra.mxu0 %v4482_v22 }
  0xeb   :  { %v6513_v40 = vsub.f32 %v6246_v17, %v7251_v16  ;;  %v6518_v35 = vsub.f32 %v6288_v15, %v7252_v60  ;;  %v7254_v55 = vand.u32 4294901760, %v6348_v45  ;;  %v4486_v17 = vpack.c.bf16 %v6348_v45, %v6335_v1  ;;  %4485 = vmatprep.subr.bf16.mxu0 %v4484_v44 }
  0xec   :  { %v2022_v25 = vsub.f32 %v6335_v1, %v7253_v34  ;;  %v7008_v15 = vand.u32 4294901760, %v6358_v36  ;;  %v4446_v60 = vpack.c.bf16 %v2002_v9, %v1995_v52  ;;  %v2009_v56 = vand.u32 4294901760, %v2008_v29  ;;  %4445 = vmatprep.subr.bf16.mxu1 %v4444_v30  ;;  %1873 = vmatmul.mubr.f32.vlgmr.msra.gmra.mrb[12].mxu1 %v5456_v37 }
  0xed   :  { %v2029_v23 = vsub.f32 %v6348_v45, %v7254_v55  ;;  %v2016_v39 = vand.u32 4294901760, %v2015_v10  ;;  %v4488_v34 = vpack.c.bf16 %v6358_v36, %v6353_v59  ;;  %v4448_v38 = vpack.c.bf16 %v2128_v6, %v2121_v47  ;;  %2215 = vmatprep.mubr.f32.mxu1 %v5945_v41 }
  0xee   :  { %v2135_v22 = vand.u32 4294901760, %v2134_v21  ;;  %v2142_v14 = vand.u32 4294901760, %v2141_v12  ;;  %v7005_v50 = vand.u32 4294901760, %v6370_v4  ;;  %v2023_v55 = vand.u32 4294901760, %v2022_v25  ;;  %4487 = vmatpush3.bf16.msra.mxu0 %v4486_v17  ;;  %4447 = vmatpush3.bf16.msra.mxu1 %v4446_v60 }
  0xef   :  { %v7004_v27 = vand.u32 4294901760, %v6375_v19  ;;  %v7000_v16 = vand.u32 4294901760, %v6380_v0  ;;  %v7001_v52 = vand.u32 4294901760, %v6385_v7  ;;  %v2030_v9 = vand.u32 4294901760, %v2029_v23  ;;  %4489 = vmatprep.subr.bf16.mxu0 %v4488_v34  ;;  %4449 = vmatprep.subr.bf16.mxu1 %v4448_v38 }
  0xf0   :  { %v7255_v29 = vand.u32 4294901760, %v6353_v59  ;;  %v2155_v44 = vsub.f32 %v6358_v36, %v7008_v15  ;;  %v4490_v28 = vpack.c.bf16 %v6375_v19, %v6370_v4  ;;  %v4450_v47 = vpack.c.bf16 %v2016_v39, %v2009_v56 }
  0xf1   :  { %v7003_v6 = vand.u32 4294901760, %v6391_v54  ;;  %v7002_v21 = vand.u32 4294901760, %v6402_v62  ;;  %v4492_v12 = vpack.c.bf16 %v6385_v7, %v6380_v0  ;;  %v4452_v30 = vpack.c.bf16 %v2142_v14, %v2135_v22 }
  0xf2   :  { %v2148_v10 = vsub.f32 %v6353_v59, %v7255_v29  ;;  %v2036_v25 = vsub.f32 %v6370_v4, %v7005_v50  ;;  %v7006_v23 = vand.u32 4294901760, %v6407_v58  ;;  %v7007_v17 = vand.u32 4294901760, %v6420_v61  ;;  %4491 = vmatpush3.bf16.msra.mxu0 %v4490_v28  ;;  %4451 = vmatpush3.bf16.msra.mxu1 %v4450_v47 }
  0xf3   :  { %v2043_v56 = vsub.f32 %v6375_v19, %v7004_v27  ;;  %v2162_v39 = vsub.f32 %v6380_v0, %v7000_v16  ;;  %v2169_v37 = vsub.f32 %v6385_v7, %v7001_v52  ;;  %v4454_v14 = vpack.c.bf16 %v2030_v9, %v2023_v55  ;;  %4493 = vmatprep.subr.bf16.mxu0 %v4492_v12 }
  0xf4   :  { %v2149_v34 = vand.u32 4294901760, %v2148_v10  ;;  %v2156_v22 = vand.u32 4294901760, %v2155_v44  ;;  %v4494_v60 = vpack.c.bf16 %v6402_v62, %v6391_v54  ;;  %v2050_v29 = vsub.f32 %v6391_v54, %v7003_v6  ;;  %4453 = vmatprep.subr.bf16.mxu1 %v4452_v30 }
  0xf5   :  { %v2057_v16 = vsub.f32 %v6402_v62, %v7002_v21  ;;  %v2063_v52 = vand.u32 4294901760, %v6423_v3  ;;  %v4496_v38 = vpack.c.bf16 %v6420_v61, %v6407_v58  ;;  %v2176_v55 = vsub.f32 %v6407_v58, %v7006_v23 }
  0xf6   :  { %v2183_v9 = vsub.f32 %v6420_v61, %v7007_v17  ;;  %v2037_v28 = vand.u32 4294901760, %v2036_v25  ;;  %v2044_v12 = vand.u32 4294901760, %v2043_v56  ;;  %v2163_v21 = vand.u32 4294901760, %v2162_v39  ;;  %4495 = vmatpush3.bf16.msra.mxu0 %v4494_v60  ;;  %4455 = vmatpush3.bf16.msra.mxu1 %v4454_v14 }
  0xf7   :  { %v2170_v6 = vand.u32 4294901760, %v2169_v37  ;;  %v7256_v27 = vand.u32 4294901760, %v6293_v18  ;;  %v4456_v23 = vpack.c.bf16 %v2156_v22, %v2149_v34  ;;  %v4498_v17 = vpack.c.bf16 %v6432_v51, %v6423_v3  ;;  %4497 = vmatprep.subr.bf16.mxu0 %v4496_v38 }
  0xf8   :  { %v2196_v15 = vand.u32 4294901760, %v6445_v48  ;;  %v2051_v10 = vand.u32 4294901760, %v2050_v29  ;;  %v2058_v44 = vand.u32 4294901760, %v2057_v16  ;;  %v2064_v47 = vsub.f32 %v6423_v3, %v2063_v52 }
  0xf9   :  { %v6588_v50 = vsub.f32 %v6293_v18, %v7256_v27  ;;  %v4500_v25 = vpack.c.bf16 %v6445_v48, %v6437_v42  ;;  %v2177_v27 = vand.u32 4294901760, %v2176_v55  ;;  %v2184_v18 = vand.u32 4294901760, %v2183_v9  ;;  %4457 = vmatprep.subr.bf16.mxu1 %v4456_v23 }
  0xfa   :  { %v7257_v30 = vand.u32 4294901760, %v6432_v51  ;;  %v7258_v39 = vand.u32 4294901760, %v6437_v42  ;;  %v4458_v16 = vpack.c.bf16 %v2044_v12, %v2037_v28  ;;  %v4460_v34 = vpack.c.bf16 %v2170_v6, %v2163_v21  ;;  %4499 = vmatpush3.bf16.msra.mxu0 %v4498_v17 }
  0xfb   :  { %v2077_v22 = vand.u32 4294901760, %v6455_v46  ;;  %v7011_v60 = vand.u32 4294901760, %v6482_v49  ;;  %v2197_v29 = vsub.f32 %v6445_v48, %v2196_v15  ;;  %v4502_v38 = vpack.c.bf16 %v6482_v49, %v6455_v46  ;;  %4501 = vmatprep.subr.bf16.mxu0 %v4500_v25 }
  0xfc   :  { %v2071_v56 = vsub.f32 %v6432_v51, %v7257_v30  ;;  %v2190_v37 = vsub.f32 %v6437_v42, %v7258_v39  ;;  %v7010_v55 = vand.u32 4294901760, %v6489_v31  ;;  %v7009_v9 = vand.u32 4294901760, %v6513_v40  ;;  %4459 = vmatpush3.bf16.msra.mxu1 %v4458_v16 }
  0xfd   :  { %v4462_v14 = vpack.c.bf16 %v2058_v44, %v2051_v10  ;;  %v4504_v6 = vpack.c.bf16 %v6513_v40, %v6489_v31  ;;  %v4464_v21 = vpack.c.bf16 %v2184_v18, %v2177_v27  ;;  %v2065_v28 = vand.u32 4294901760, %v2064_v47  ;;  %4461 = vmatprep.subr.bf16.mxu1 %v4460_v34 }
  0xfe   :  { %v2072_v23 = vand.u32 4294901760, %v2071_v56  ;;  %v2191_v17 = vand.u32 4294901760, %v2190_v37  ;;  %v2078_v12 = vsub.f32 %v6455_v46, %v2077_v22  ;;  %v2085_v30 = vsub.f32 %v6482_v49, %v7011_v60  ;;  %4503 = vmatpush3.bf16.msra.mxu0 %v4502_v38 }
  0xff   :  { %v2091_v39 = vand.u32 4294901760, %v6518_v35  ;;  %v2098_v10 = vand.u32 4294901760, %v6588_v50  ;;  %v2198_v44 = vand.u32 4294901760, %v2197_v29  ;;  %v2204_v47 = vsub.f32 %v6489_v31, %v7010_v55  ;;  %4505 = vmatprep.subr.bf16.mxu0 %v4504_v6 }
 0x100   :  { %v2211_v25 = vsub.f32 %v6513_v40, %v7009_v9  ;;  %v4506_v27 = vpack.c.bf16 %v6588_v50, %v6518_v35  ;;  %v7259_v18 = vand.u32 4294901760, %v6251_v24  ;;  %v7260_v56 = vand.u32 4294901760, %v6261_v26  ;;  %4463 = vmatpush3.bf16.msra.mxu1 %v4462_v14 }
 0x101   :  { %v4466_v16 = vpack.c.bf16 %v2072_v23, %v2065_v28  ;;  %v2079_v34 = vand.u32 4294901760, %v2078_v12  ;;  %v2086_v29 = vand.u32 4294901760, %v2085_v30  ;;  %v2092_v38 = vsub.f32 %v6518_v35, %v2091_v39  ;;  %4465 = vmatprep.subr.bf16.mxu1 %v4464_v21  ;;  %v3334_v28 = vpop.f32.mrb[0].mxu1  ;;  %v7299_v35 = vld [vmem:[#allocation15_spill] sm:$0xff] }
 0x102   :  { %v4540_v37 = vpack.c.bf16 %v7260_v56, %v7259_v18  ;;  %v2099_v9 = vsub.f32 %v6588_v50, %v2098_v10  ;;  %v4468_v55 = vpack.c.bf16 %v2198_v44, %v2191_v17  ;;  %v2205_v6 = vand.u32 4294901760, %v2204_v47  ;;  %4507 = vmatpush3.bf16.msra.mxu0 %v4506_v27  ;;  %v3335_v18 = vpop.f32.mrb[1].mxu1 }
 0x103   :  { %v2212_v60 = vand.u32 4294901760, %v2211_v25  ;;  %v7261_v26 = vand.u32 4294901760, %v6274_v20  ;;  %v7262_v24 = vand.u32 4294901760, %v6298_v13  ;;  %v7263_v23 = vand.u32 4294901760, %v6303_v53 }
 0x104   :  { %4541 = vmatprep.subr.bf16.mxu0 %v4540_v37  ;;  %v7264_v12 = vand.u32 4294901760, %v6308_v5  ;;  %v3336_v56 = vadd.f32 %v3335_v18, %v3334_v28  ;;  %4467 = vmatpush3.bf16.msra.mxu1 %v4466_v16  ;;  %v4470_v21 = vpack.c.bf16 %v2086_v29, %v2079_v34  ;;  %v2093_v17 = vand.u32 4294901760, %v2092_v38  ;;  %v7279_v38 = vld [vmem:[#allocation16_spill] sm:$0xff] }
 0x105   :  { %v4542_v14 = vpack.c.bf16 %v7262_v24, %v7261_v26  ;;  %v2100_v44 = vand.u32 4294901760, %v2099_v9  ;;  %2355 = vmatmul.mubr.f32.vlgmr.msra.gmra.mrb[12].mxu0 %v6256_v32  ;;  %4469 = vmatprep.subr.bf16.mxu1 %v4468_v55  ;;  %v4472_v20 = vpack.c.bf16 %v2212_v60, %v2205_v6  ;;  %v7265_v13 = vand.u32 4294901760, %v6313_v33  ;;  %v7284_v24 = vld [vmem:[#allocation6_spill] sm:$0xff] }
 0x106   :  { %v4544_v30 = vpack.c.bf16 %v7264_v12, %v7263_v23  ;;  %v7266_v47 = vand.u32 4294901760, %v6318_v43  ;;  %v7267_v5 = vand.u32 4294901760, %v6324_v57  ;;  %v7268_v53 = vand.u32 4294901760, %v6329_v11  ;;  %2629 = vmatprep.mubr.f32.mxu0 %v5945_v41  ;;  %v7288_v12 = vld [vmem:[#allocation8_spill] sm:$0xff] }
 0x107   :  { %4543 = vmatpush3.bf16.msra.mxu0 %v4542_v14  ;;  %v4474_v9 = vpack.c.bf16 %v2100_v44, %v2093_v17  ;;  %v7269_v60 = vand.u32 4294901760, %v6335_v1  ;;  %v7270_v55 = vand.u32 4294901760, %v6348_v45  ;;  %v7271_v43 = vand.u32 4294901760, %v6353_v59  ;;  %v7277_v59 = vld [vmem:[#allocation5_spill] sm:$0xff]  ;;  %v7285_v14 = vld [vmem:[#allocation7_spill] sm:$0xff] }
 0x108   :  { %v4546_v25 = vpack.c.bf16 %v7266_v47, %v7265_v13  ;;  %4545 = vmatprep.subr.bf16.mxu0 %v4544_v30  ;;  %v4548_v27 = vpack.c.bf16 %v7268_v53, %v7267_v5  ;;  %4471 = vmatpush3.bf16.msra.mxu1 %v4470_v21  ;;  %v7272_v37 = vand.u32 4294901760, %v6358_v36  ;;  %v7273_v11 = vand.u32 4294901760, %v6370_v4  ;;  %v7289_v30 = vld [vmem:[#allocation18_spill] sm:$0xff]  ;;  %v7294_v17 = vld [vmem:[#allocation9_spill] sm:$0xff]  ;;  %v7301_v53 = vld [vmem:[#allocation19_spill] sm:$0xff] }
 0x109   :  { %4473 = vmatprep.subr.bf16.mxu1 %v4472_v20  ;;  %v4550_v33 = vpack.c.bf16 %v7270_v55, %v7269_v60  ;;  %v7274_v16 = vand.u32 4294901760, %v6375_v19  ;;  %v7275_v1 = vand.u32 4294901760, %v6380_v0  ;;  %v7276_v45 = vand.u32 4294901760, %v6385_v7  ;;  %v6714_v44 = vld [vmem:[%s6826_s3] sm:$0xff]  ;;  %v7295_v20 = vld [vmem:[#allocation10_spill] sm:$0xff] }
 0x10a   :  { %v4552_v57 = vpack.c.bf16 %v7272_v37, %v7271_v43  ;;  %v7278_v36 = vand.u32 4294901760, %v7277_v59  ;;  %v7280_v4 = vand.u32 4294901760, %v6391_v54  ;;  %v7281_v19 = vand.u32 4294901760, %v6402_v62  ;;  %v7298_v5 = vld [vmem:[#allocation13_spill] sm:$0xff] }
 0x10b   :  { %4547 = vmatpush3.bf16.msra.mxu0 %v4546_v25  ;;  %v4554_v34 = vpack.c.bf16 %v7274_v16, %v7273_v11  ;;  %v4556_v29 = vpack.c.bf16 %v7276_v45, %v7275_v1  ;;  %v7282_v0 = vand.u32 4294901760, %v6407_v58  ;;  %v7283_v7 = vand.u32 4294901760, %v6420_v61 }
 0x10c   :  { %4549 = vmatprep.subr.bf16.mxu0 %v4548_v27  ;;  %4475 = vmatpush3.bf16.msra.mxu1 %v4474_v9  ;;  %v4558_v6 = vpack.c.bf16 %v7281_v19, %v7280_v4  ;;  %v7286_v28 = vand.u32 4294901760, %v6432_v51  ;;  %v7287_v54 = vand.u32 4294901760, %v6437_v42  ;;  %v7290_v3 = vand.u32 4294901760, %v6482_v49  ;;  %v7296_v49 = vld [vmem:[#allocation11_spill] sm:$0xff]  ;;  %v7302_v27 = vld [vmem:[#allocation20_spill] sm:$0xff] }
 0x10d   :  { %4509 = vmatprep.subr.bf16.mxu1 %v6015_v2  ;;  %v4560_v26 = vpack.c.bf16 %v7283_v7, %v7282_v0  ;;  %v7292_v42 = vand.u32 4294901760, %v6513_v40  ;;  %v7297_v40 = vld [vmem:[#allocation12_spill] sm:$0xff]  ;;  %v7303_v9 = vand.u32 4294901760, %v6256_v32 }
 0x10e   :  { %v4562_v23 = vpack.c.bf16 %v7286_v28, %v2063_v52  ;;  %v4564_v62 = vpack.c.bf16 %v2196_v15, %v7287_v54  ;;  %v4566_v51 = vpack.c.bf16 %v7290_v3, %v2077_v22  ;;  %v7291_v52 = vand.u32 4294901760, %v6489_v31  ;;  %v7293_v15 = vld [vmem:[#allocation14_spill] sm:$0xff] }
 0x10f   :  { %4551 = vmatpush3.bf16.msra.mxu0 %v4550_v33  ;;  %2217 = vmatmul.mubr.f32.vlgmr.msra.gmra.mrb[14].mxu1 %v6207_v8  ;;  %v119_v21 = vsub.s32 0, %v7293_v15  ;;  %v4570_v31 = vpack.c.bf16 %v2098_v10, %v2091_v39  ;;  %v7300_v10 = vld [vmem:[#allocation17_spill] sm:$0xff] }
 0x110   :  { %4553 = vmatprep.subr.bf16.mxu0 %v4552_v57  ;;  %4511 = vmatpush3.bf16.msra.mxu1 %v6048_v63  ;;  %v4568_v48 = vpack.c.bf16 %v7292_v42, %v7291_v52 }
 0x111   :  { %2459 = vmatprep.mubr.f32.mxu1 %v7278_v36  ;;  %4513 = vmatprep.subr.bf16.mxu1 %v7279_v38  ;;  %v120_v46 = vrot.slane %v6714_v44, %v119_v21 }
 0x112   :  { %v3404_v58 = vpop.f32.mrb[0].mxu0 }
 0x113   :  { %4555 = vmatpush3.bf16.msra.mxu0 %v4554_v34  ;;  %v3405_v61 = vpop.f32.mrb[1].mxu0  ;;  %v263_v47 = vadd.f32 %v3336_v56, %v120_v46 }
 0x114   :  { %4557 = vmatprep.subr.bf16.mxu0 %v4556_v29  ;;  %4515 = vmatpush3.bf16.msra.mxu1 %v7284_v24  ;;  %v3406_v18 = vadd.f32 %v3405_v61, %v3404_v58 }
 0x115   :  { %4517 = vmatprep.subr.bf16.mxu1 %v7285_v14 }
 0x117   :  { %4559 = vmatpush3.bf16.msra.mxu0 %v4558_v6 }
 0x118   :  { %4561 = vmatprep.subr.bf16.mxu0 %v4560_v26  ;;  %4519 = vmatpush3.bf16.msra.mxu1 %v7288_v12 }
 0x119   :  { %4521 = vmatprep.subr.bf16.mxu1 %v7289_v30 }
 0x11b   :  { %4563 = vmatpush3.bf16.msra.mxu0 %v4562_v23 }
 0x11c   :  { %4565 = vmatprep.subr.bf16.mxu0 %v4564_v62  ;;  %4523 = vmatpush3.bf16.msra.mxu1 %v7294_v17  ;;  %v3369_v22 = vpop.f32.mrb[2].mxu1 }
 0x11d   :  { %4525 = vmatprep.subr.bf16.mxu1 %v7295_v20  ;;  %v3370_v13 = vpop.f32.mrb[3].mxu1 }
 0x11e   :  { %v3371_v25 = vadd.f32 %v3370_v13, %v3369_v22 }
 0x11f   :  { %4567 = vmatpush3.bf16.msra.mxu0 %v4566_v51 }
 0x120   :  { %4569 = vmatprep.subr.bf16.mxu0 %v4568_v48  ;;  %4527 = vmatpush3.bf16.msra.mxu1 %v7296_v49  ;;  %v495_v50 = vadd.f32 %v3371_v25, %v263_v47 }
 0x121   :  { %4529 = vmatprep.subr.bf16.mxu1 %v7297_v40 }
 0x122   :  { %v633_v39 = vadd.f32 %v3406_v18, %v495_v50 }
 0x123   :  { %4571 = vmatpush3.bf16.msra.mxu0 %v4570_v31 }
 0x124   :  { %4531 = vmatpush3.bf16.msra.mxu1 %v7298_v5 }
 0x125   :  { %4533 = vmatprep.subr.bf16.mxu1 %v7299_v35 }
 0x126   :  { %2631 = vmatmul.mubr.f32.vlgmr.msra.gmra.mrb[14].mxu0 %v6207_v8 }
 0x128   :  { %4535 = vmatpush3.bf16.msra.mxu1 %v7300_v10 }
 0x129   :  { %4537 = vmatprep.subr.bf16.mxu1 %v7301_v53 }
 0x12c   :  { %4539 = vmatpush3.bf16.msra.mxu1 %v7302_v27 }
 0x12d   :  { %4573 = vmatprep.subr.bf16.mxu1 %v6015_v2 }
 0x12f   :  { %2463 = vmatmul.mubr.f32.vlgmr.msra.gmra.mrb[16].mxu1 %v7303_v9 }
 0x130   :  { %4575 = vmatpush3.bf16.msra.mxu1 %v6048_v63  ;;  %2733 = vmatprep.mubr.f32.mxu1 %v5945_v41 }
 0x131   :  { %4577 = vmatprep.subr.bf16.mxu1 %v7279_v38 }
 0x132   :  { %v3474_v56 = vpop.f32.mrb[2].mxu0 }
 0x133   :  { %v3475_v60 = vpop.f32.mrb[3].mxu0 }
 0x134   :  { %4579 = vmatpush3.bf16.msra.mxu1 %v7284_v24  ;;  %v3476_v2 = vadd.f32 %v3475_v60, %v3474_v56 }
 0x135   :  { %4581 = vmatprep.subr.bf16.mxu1 %v7285_v14 }
 0x138   :  { %4583 = vmatpush3.bf16.msra.mxu1 %v7288_v12 }
 0x139   :  { %4585 = vmatprep.subr.bf16.mxu1 %v7289_v30 }
 0x13c   :  { %4587 = vmatpush3.bf16.msra.mxu1 %v7294_v17  ;;  %v3439_v41 = vpop.f32.mrb[4].mxu1 }
 0x13d   :  { %4589 = vmatprep.subr.bf16.mxu1 %v7295_v20  ;;  %v3440_v63 = vpop.f32.mrb[5].mxu1 }
 0x13e   :  { %v3441_v32 = vadd.f32 %v3440_v63, %v3439_v41  ;;  %v2766_v63 = vld [vmem:[%s6825_s2] sm:$0xff] }
 0x140   :  { %4591 = vmatpush3.bf16.msra.mxu1 %v7296_v49  ;;  %v741_v55 = vadd.f32 %v3441_v32, %v633_v39  ;;  %v2767_v32 = vld [vmem:[%s6825_s2 + $0x8] sm:$0xff] }
 0x141   :  { %4593 = vmatprep.subr.bf16.mxu1 %v7297_v40 }
 0x142   :  { %v909_v33 = vadd.f32 %v3476_v2, %v741_v55  ;;  %v2768_v55 = vld [vmem:[%s6825_s2 + $0x10] sm:$0xff] }
 0x144   :  { %4595 = vmatpush3.bf16.msra.mxu1 %v7298_v5 }
 0x145   :  { %4597 = vmatprep.subr.bf16.mxu1 %v7299_v35 }
 0x148   :  { %4599 = vmatpush3.bf16.msra.mxu1 %v7300_v10 }
 0x149   :  { %4601 = vmatprep.subr.bf16.mxu1 %v7301_v53 }
 0x14c   :  { %4603 = vmatpush3.bf16.msra.mxu1 %v7302_v27 }
 0x14f   :  { %2735 = vmatmul.mubr.f32.vlgmr.msra.gmra.mrb[18].mxu1 %v6207_v8 }
 0x154   :  { %v3544_v43 = vpop.f32.mrb[4].mxu0 }
 0x155   :  { %v3545_v37 = vpop.f32.mrb[5].mxu0 }
 0x156   :  { %v3546_v57 = vadd.f32 %v3545_v37, %v3544_v43  ;;  %v2779_v43 = vand.u32 4294901760, %v2766_v63  ;;  %v2782_v37 = vand.u32 4294901760, %v2767_v32 }
 0x15d   :  { %v3509_v11 = vpop.f32.mrb[6].mxu1 }
 0x15e   :  { %v3510_v16 = vpop.f32.mrb[7].mxu1 }
 0x15f   :  { %v3511_v34 = vadd.f32 %v3510_v16, %v3509_v11  ;;  %v2785_v11 = vand.u32 4294901760, %v2768_v55  ;;  %v4688_v16 = vmov 0.0  }
 0x160   :  { %3970 = vmatprep.mubr.msk.f32.mxu0 %vm4687_vm1, %v4688_v16 }
 0x161   :  { %v1013_v1 = vadd.f32 %v3511_v34, %v909_v33  ;;  %v4686_v33 = vmov 0.0|0.0  }
 0x162   :  { %4604 = vmatprep.subr.bf16.mxu0 %v4686_v33 }
 0x163   :  { %v1125_v45 = vadd.f32 %v3546_v57, %v1013_v1  ;;  %v2769_v57 = vld [vmem:[%s6825_s2 + $0x18] sm:$0xff]  ;;  %v6767_v1 = vpack.c.bf16 %v2782_v37, %v2779_v43  ;;  %s4689_s2 = smov [#allocation2]  }
 0x164   :  { %v2788_v34 = vand.u32 4294901760, %v2769_v57  ;;  %s3293_s8 = sshll.u32 %s4689_s2, 4  ;;  %s3294_s8 = int_to_ptr.vmem [resolvable:$true] %s3293_s8 }
 0x165   :  { %4606 = vmatpush3.bf16.msra.mxu0 %v6767_v1  ;;  %s4661_s9 = scalar_lea.vmem %s3294_s8, 32  ;;  %p4666_p1 = scmp.lt.s32.totalorder %s3294_s8, %s3294_s8 }
 0x166   :  { %4607 = vmatprep.subr.bf16.mxu0 %v4686_v33  ;;  %p4662_p0 = scmp.ne.s32.totalorder %s3294_s8, %s4661_s9  ;;  %p4667_p2 = scmp.lt.s32.totalorder %s4661_s9, %s4661_s9 }
 0x168   :  { %p4668_p3 = por %p4667_p2, %p4666_p1 }
 0x16a   :  { %p4669_p4 = pnand %p4668_p3, %p4662_p0 }
 0x175   :  { %v3614_v29 = vpop.f32.mrb[6].mxu0 }
 0x176   :  { %v3615_v59 = vpop.f32.mrb[7].mxu0 }
 0x177   :  { %v3616_v36 = vadd.f32 %v3615_v59, %v3614_v29  ;;  %v2866_v29 = vsub.f32 %v2767_v32, %v2782_v37  ;;  %v2873_v59 = vsub.f32 %v2768_v55, %v2785_v11  ;;  %v3283_v37 = vsub.s32 5, %v7293_v15 }
 0x17f   :  { %v3579_v38 = vpop.f32.mrb[8].mxu1 }
 0x180   :  { %v3580_v4 = vpop.f32.mrb[9].mxu1 }
 0x181   :  { %v3581_v19 = vadd.f32 %v3580_v4, %v3579_v38  ;;  %v6770_v38 = vpack.c.bf16 %v2788_v34, %v2785_v11 }
 0x183   :  { %v1357_v6 = vadd.f32 %v3581_v19, %v1125_v45  ;;  %v2859_v45 = vsub.f32 %v2766_v63, %v2779_v43  ;;  %v2867_v19 = vand.u32 4294901760, %v2866_v29  ;;  %4609 = vmatpush3.bf16.msra.mxu0 %v6770_v38  ;;  %v3278_v43 = vsub.s32 4, %v7293_v15 }
 0x184   :  { %4610 = vmatprep.subr.bf16.mxu0 %v4686_v33 }
 0x185   :  { %v1495_v0 = vadd.f32 %v3616_v36, %v1357_v6  ;;  %v2880_v36 = vsub.f32 %v2769_v57, %v2788_v34  ;;  %v2860_v4 = vand.u32 4294901760, %v2859_v45  ;;  %v3279_v57 = vrot.slane %v6714_v44, %v3278_v43 }
 0x186   :  { %v3284_v34 = vrot.slane %v6714_v44, %v3283_v37 }
 0x187   :  { %v2861_v6 = vsub.f32 %v2859_v45, %v2860_v4 }
 0x196   :  { %v3684_v7 = vpop.f32.mrb[8].mxu0 }
 0x197   :  { %v3685_v26 = vpop.f32.mrb[9].mxu0 }
 0x198   :  { %v3686_v24 = vadd.f32 %v3685_v26, %v3684_v7  ;;  %v2862_v7 = vand.u32 4294901760, %v2861_v6 }
 0x19f   :  { %v3649_v8 = vpop.f32.mrb[10].mxu1 }
 0x1a0   :  { %v3650_v14 = vpop.f32.mrb[11].mxu1 }
 0x1a1   :  { %v3651_v28 = vadd.f32 %v3650_v14, %v3649_v8  ;;  %v2881_v8 = vand.u32 4294901760, %v2880_v36 }
 0x1a3   :  { %v1603_v23 = vadd.f32 %v3651_v28, %v1495_v0  ;;  %v2868_v0 = vsub.f32 %v2866_v29, %v2867_v19 }
 0x1a5   :  { %v1771_v54 = vadd.f32 %v3686_v24, %v1603_v23  ;;  %v2869_v26 = vand.u32 4294901760, %v2868_v0  ;;  %v2874_v24 = vand.u32 4294901760, %v2873_v59  ;;  %v2882_v23 = vsub.f32 %v2880_v36, %v2881_v8 }
 0x1a7   :  { %v4611_v14 = vpack.c.bf16 %v2869_v26, %v2862_v7  ;;  %v2875_v28 = vsub.f32 %v2873_v59, %v2874_v24 }
 0x1b8   :  { %v3754_v62 = vpop.f32.mrb[10].mxu0 }
 0x1b9   :  { %v3755_v58 = vpop.f32.mrb[11].mxu0 }
 0x1ba   :  { %v3756_v12 = vadd.f32 %v3755_v58, %v3754_v62  ;;  %v2883_v62 = vand.u32 4294901760, %v2882_v23 }
 0x1bf   :  { %v3719_v61 = vpop.f32.mrb[12].mxu1 }
 0x1c0   :  { %v3720_v30 = vpop.f32.mrb[13].mxu1 }
 0x1c1   :  { %v3721_v18 = vadd.f32 %v3720_v30, %v3719_v61  ;;  %v4620_v61 = vpack.c.bf16 %v2880_v36, %v2873_v59  ;;  %v4629_v30 = vpack.c.bf16 %v2867_v19, %v2860_v4 }
 0x1c3   :  { %v1875_v3 = vadd.f32 %v3721_v18, %v1771_v54  ;;  %v2876_v54 = vand.u32 4294901760, %v2875_v28  ;;  %v4632_v18 = vpack.c.bf16 %v2881_v8, %v2874_v24 }
 0x1c5   :  { %v1987_v51 = vadd.f32 %v3756_v12, %v1875_v3  ;;  %v4614_v58 = vpack.c.bf16 %v2883_v62, %v2876_v54  ;;  %v4617_v12 = vpack.c.bf16 %v2866_v29, %v2859_v45 }
 0x1d8   :  { %v3824_v52 = vpop.f32.mrb[12].mxu0 }
 0x1d9   :  { %v3825_v42 = vpop.f32.mrb[13].mxu0 }
 0x1da   :  { %v3826_v48 = vadd.f32 %v3825_v42, %v3824_v52  ;;  %v2757_v42 = vsub.s32 1, %v7293_v15 }
 0x1e2   :  { %v3789_v21 = vpop.f32.mrb[14].mxu1 }
 0x1e3   :  { %v3790_v17 = vpop.f32.mrb[15].mxu1 }
 0x1e4   :  { %v3791_v20 = vadd.f32 %v3790_v17, %v3789_v21  ;;  %v2758_v21 = vrot.slane %v6714_v44, %v2757_v42 }
 0x1e6   :  { %v2219_v31 = vadd.f32 %v3791_v20, %v1987_v51 }
 0x1e8   :  { %v2357_v46 = vadd.f32 %v3826_v48, %v2219_v31  ;;  %v2762_v48 = vsub.s32 2, %v7293_v15 }
 0x1ea   :  { %v2763_v20 = vrot.slane %v6714_v44, %v2762_v48 }
 0x1f9   :  { %v3894_v49 = vpop.f32.mrb[14].mxu0 }
 0x1fa   :  { %v3895_v40 = vpop.f32.mrb[15].mxu0 }
 0x1fb   :  { %v3896_v22 = vadd.f32 %v3895_v40, %v3894_v49 }
 0x202   :  { %v3859_v13 = vpop.f32.mrb[16].mxu1 }
 0x203   :  { %v3860_v47 = vpop.f32.mrb[17].mxu1 }
 0x204   :  { %v3861_v25 = vadd.f32 %v3860_v47, %v3859_v13 }
 0x206   :  { %v2465_v5 = vadd.f32 %v3861_v25, %v2357_v46 }
 0x208   :  { %v2633_v35 = vadd.f32 %v3896_v22, %v2465_v5 }
 0x222   :  { %v3929_v50 = vpop.f32.mrb[18].mxu1 }
 0x223   :  { %v3930_v39 = vpop.f32.mrb[19].mxu1 }
 0x224   :  { %v3931_v10 = vadd.f32 %v3930_v39, %v3929_v50  ;;  %v2772_v50 = vsub.s32 3, %v7293_v15 }
 0x226   :  { %v2737_v53 = vadd.f32 %v3931_v10, %v2633_v35  ;;  %v2773_v39 = vrot.slane %v6714_v44, %v2772_v50 }
 0x228   :  { %v2741_v27 = vsel %vm2740_vm0, %v2737_v53, 0.0 }
 0x229   :  { %2742 = vadd.xlane.f32.xlu0 %v2741_v27 }
 0x2b6   :  { %v2743_v9 = vpop.xlane.xlu0 %2742 }
 0x2b7   :  { %v2745_v56 = vmul.f32 0.03125, %v2743_v9 }
 0x2b9   :  { %v2746_v60 = vsub.f32 %v2737_v53, %v2745_v56 }
 0x2bb   :  { %v2747_v2 = vmul.f32 %v2746_v60, %v2746_v60 }
 0x2bd   :  { %v2748_v41 = vsel %vm2740_vm0, %v2747_v2, 0.0 }
 0x2be   :  { %2749 = vadd.xlane.f32.xlu0 %v2748_v41 }
 0x34b   :  { %v2750_v3 = vpop.xlane.xlu0 %2749 }
 0x34c   :  { %v2751_v51 = vmul.f32 0.03125, %v2750_v3 }
 0x34e   :  { %v2752_v52 = vadd.f32 1e-05, %v2751_v51 }
 0x350   :  { %4657 = vrsqrt.f32 %v2752_v52 }
 0x35a   :  { %v4658_v17 = vpop.eup %4657 }
 0x35b   :  { %v2754_v31 = vmul.f32 %v4658_v17, %v2746_v60 }
 0x35d   :  { %v2759_v46 = vmul.f32 %v2758_v21, %v2754_v31 }
 0x35f   :  { %v2764_v49 = vadd.f32 %v2763_v20, %v2759_v46 }
 0x361   :  { %v2765_v40 = vmax.f32 %v2764_v49, 0.0 }
 0x363   :  { %v2776_v22 = vsel %vm2774_vm2, %v2765_v40, 0 }
 0x364   :  { %v2847_v13 = vand.u32 4294901760, %v2776_v22 }
 0x366   :  { %v2848_v47 = vsub.f32 %v2776_v22, %v2847_v13 }
 0x368   :  { %v2849_v25 = vand.u32 4294901760, %v2848_v47 }
 0x36a   :  { %v2850_v5 = vsub.f32 %v2848_v47, %v2849_v25 }
 0x36c   :  { %v2851_v35 = vand.u32 4294901760, %v2850_v5 }
 0x36e   :  { %3971 = vmatmul.mubr.f32.vlgmr.msra.gmra.mrb[16].mxu0 %v2851_v35 }
 0x36f   :  { %4612 = vmatpush3.bf16.msra.mxu0 %v4611_v14  ;;  %3981 = vmatprep.mubr.msk.f32.mxu0 %vm4687_vm1, %v4688_v16 }
 0x370   :  { %4613 = vmatprep.subr.bf16.mxu0 %v4686_v33 }
 0x373   :  { %4615 = vmatpush3.bf16.msra.mxu0 %v4614_v58 }
 0x374   :  { %4616 = vmatprep.subr.bf16.mxu0 %v4686_v33 }
 0x376   :  { %3982 = vmatmul.mubr.f32.vlgmr.msra.gmra.mrb[16].mxu0 %v2847_v13 }
 0x377   :  { %4618 = vmatpush3.bf16.msra.mxu0 %v4617_v12  ;;  %3992 = vmatprep.mubr.msk.f32.mxu0 %vm4687_vm1, %v4688_v16 }
 0x378   :  { %4619 = vmatprep.subr.bf16.mxu0 %v4686_v33 }
 0x37b   :  { %4621 = vmatpush3.bf16.msra.mxu0 %v4620_v61 }
 0x37c   :  { %4622 = vmatprep.subr.bf16.mxu0 %v4686_v33 }
 0x37e   :  { %3993 = vmatmul.mubr.f32.vlgmr.msra.gmra.mrb[16].mxu0 %v2848_v47 }
 0x37f   :  { %4624 = vmatpush3.bf16.msra.mxu0 %v6767_v1  ;;  %4003 = vmatprep.mubr.msk.f32.mxu0 %vm4687_vm1, %v4688_v16 }
 0x380   :  { %4625 = vmatprep.subr.bf16.mxu0 %v4686_v33 }
 0x383   :  { %4627 = vmatpush3.bf16.msra.mxu0 %v6770_v38 }
 0x384   :  { %4628 = vmatprep.subr.bf16.mxu0 %v4686_v33 }
 0x386   :  { %4004 = vmatmul.mubr.f32.vlgmr.msra.gmra.mrb[16].mxu0 %v2849_v25 }
 0x387   :  { %4630 = vmatpush3.bf16.msra.mxu0 %v4629_v30  ;;  %4014 = vmatprep.mubr.msk.f32.mxu0 %vm4687_vm1, %v4688_v16 }
 0x388   :  { %4631 = vmatprep.subr.bf16.mxu0 %v4686_v33 }
 0x38b   :  { %4633 = vmatpush3.bf16.msra.mxu0 %v4632_v18 }
 0x38c   :  { %4634 = vmatprep.subr.bf16.mxu0 %v4686_v33 }
 0x38e   :  { %4015 = vmatmul.mubr.f32.vlgmr.msra.gmra.mrb[16].mxu0 %v2847_v13 }
 0x38f   :  { %4636 = vmatpush3.bf16.msra.mxu0 %v6767_v1  ;;  %4025 = vmatprep.mubr.msk.f32.mxu0 %vm4687_vm1, %v4688_v16 }
 0x390   :  { %4637 = vmatprep.subr.bf16.mxu0 %v4686_v33 }
 0x393   :  { %4639 = vmatpush3.bf16.msra.mxu0 %v6770_v38 }
 0x396   :  { %4026 = vmatmul.mubr.f32.vlgmr.msra.gmra.mrb[16].mxu0 %v2847_v13 }
 0x469   :  { %v3259_v10 = vpop.f32.mrb[16].mxu0 }
 0x46a   :  { %v4640_v53 = vadd.f32 %v3259_v10, %v2773_v39  ;;  %v4027_v27 = vpop.f32.mrb[17].mxu0 }
 0x46c   :  { %v3263_v9 = vsel %vm2740_vm0, %v4640_v53, 0.0 }
 0x46d   :  { %3264 = vadd.xlane.f32.xlu1 %v3263_v9 }
 0x4fa   :  { %v3265_v56 = vpop.xlane.xlu1 %3264 }
 0x4fb   :  { %v3266_v60 = vmul.f32 0.03125, %v3265_v56 }
 0x4fd   :  { %v3267_v2 = vsub.f32 %v4640_v53, %v3266_v60 }
 0x4ff   :  { %v3268_v41 = vmul.f32 %v3267_v2, %v3267_v2 }
 0x501   :  { %v3269_v63 = vsel %vm2740_vm0, %v3268_v41, 0.0 }
 0x502   :  { %3270 = vadd.xlane.f32.xlu1 %v3269_v63 }
 0x58f   :  { %v3271_v32 = vpop.xlane.xlu1 %3270 }
 0x590   :  { %v3272_v55 = vmul.f32 0.03125, %v3271_v32 }
 0x592   :  { %v3273_v33 = vadd.f32 1e-05, %v3272_v55 }
 0x594   :  { %4659 = vrsqrt.f32 %v3273_v33 }
 0x59e   :  { %v4660_v11 = vpop.eup %4659 }
 0x59f   :  { %v3275_v16 = vmul.f32 %v4660_v11, %v3267_v2 }
 0x5a1   :  { %v3280_v1 = vmul.f32 %v3279_v57, %v3275_v16 }
 0x5a3   :  { %v3285_v45 = vadd.f32 %v3284_v34, %v3280_v1 }
 0x5a5   :  { %3286 = vst.msk [vmem:[#allocation2] sm:$0x3] %vm2740_vm0, %v3285_v45 }
 0x5a6   :  { %4672 = shalt.err (!%p4669_p4)
}
 0x5a7   :  { %s4673_s12 = scalar_lea.hbm %s6827_s4, 32 }
 0x5a8   :  { %p4674_p5 = scmp.ne.s32.totalorder %s6827_s4, %s4673_s12  ;;  %p4677_p6 = scmp.lt.u32.totalorder %s4673_s12, %s6827_s4 }
 0x5aa   :  { %p4679_p7 = pnand %p4677_p6, %p4674_p5 }
 0x5ac   :  { %4682 = shalt.err (!%p4679_p7)
}
 0x5ad   :  { %3296 = dma.vmem_to_hbm [thread:$0]  %s3294_s8, 32, %s6827_s4, [#allocation3]  }
 0x5ae   :  { %4683 = dma.done.wait [#allocation3], 32  }
 0x5af   :  { %4684 = vsyncadd [#allocation3], 4294967264 }
 0x5b0   :  { %3300 = vsyncpa [#allocation3], 1 }

</bundles_post_ra>
